<compile_context>
chip_gen: v6e
topology: v6e:2x2x1
jax: 0.10.0
libtpu: 0.0.40
codegen_flags: <defaults>
</compile_context>

<pallas_src>
import functools

import jax
import jax.numpy as jnp
from jax.experimental import pallas as pl
from jax.experimental.pallas import tpu as pltpu


def _attention_kernel(x_ref, wqkv_ref, bqkv_ref, wo_ref, bo_ref, o_ref,
                      *, n_heads, d_k, compute_dtype):
    # x_ref : (1, C, S)            wqkv : (3*hd, C)   bqkv : (3*hd, 1)
    # wo    : (C, hd)              bo   : (C, 1)      o_ref: (1, C, S)
    S = x_ref.shape[-1]
    hd = n_heads * d_k

    x = x_ref[0]                      # (C, S) float32 (kept f32 for the residual add)
    xm = x.astype(compute_dtype)      # MXU operand

    # Fused Q/K/V projection: one weight push, S stays on the lane axis.
    # The softmax scale is already folded into the q rows of wqkv / bqkv.
    qkvT = (jnp.dot(wqkv_ref[...], xm, preferred_element_type=jnp.float32)
            + bqkv_ref[...])                                     # (3*hd, S)
    qT = qkvT[0 * hd:1 * hd].reshape(n_heads, d_k, S)            # (h, d, S)
    kT = qkvT[1 * hd:2 * hd].reshape(n_heads, d_k, S)
    vT = qkvT[2 * hd:3 * hd].reshape(n_heads, d_k, S)

    # scores[h, i, j] = sum_d q[i,h,d] * k[j,h,d] * scale  (heads batched on the MXU;
    # S stays on the lane axis of kT and of the score output).
    q3 = jnp.swapaxes(qT, 1, 2)                                  # (h, S_i, d)
    scores = jnp.einsum('hid,hdj->hij',
                        q3.astype(compute_dtype), kT.astype(compute_dtype),
                        preferred_element_type=jnp.float32)      # (h, S_i, S_j)

    # torch `attn.softmax(dim=1)` == softmax over the query index i (axis 1 here).
    # Softmax math kept in float32 on all chip generations.
    m = jnp.max(scores, axis=1, keepdims=True)                   # (h, 1, S_j)
    e = jnp.exp(scores - m)
    denom = jnp.sum(e, axis=1, keepdims=True)
    p = e * pl.reciprocal(denom, approx=True)                    # (h, S_i, S_j)

    # res[h, d, i] = sum_j v[h,d,j] * p[h,i,j] : contraction depth S, output lanes = S.
    resT = jnp.einsum('hdj,hij->hdi',
                      vT.astype(compute_dtype), p.astype(compute_dtype),
                      preferred_element_type=jnp.float32)        # (h, d, S_i)
    resT = resT.reshape(hd, S)

    # Output projection + residual (residual added in float32).
    outT = jnp.dot(wo_ref[...], resT.astype(compute_dtype),
                   preferred_element_type=jnp.float32) + bo_ref[...]
    o_ref[0] = (outT + x).astype(o_ref.dtype)


def _prepare_params(params, *, n_heads, d_k, compute_dtype):
    """Stack proj_w/proj_b into one head-contiguous (q|k|v) slab, fold in the softmax
    scale, and lay everything out for the channels-first kernel."""
    C = params["out_w"].shape[0]
    hd = n_heads * d_k
    scale = float(d_k) ** -0.5
    # nn.Linear weight layout is (out_features, in_features); the out-feature index is
    # (head, q/k/v, d) after the module's .view(..., n_heads, 3*d_k) + chunk(3, dim=-1).
    wp = params["proj_w"].reshape(n_heads, 3, d_k, C)
    bp = params["proj_b"].reshape(n_heads, 3, d_k)
    wq = (wp[:, 0] * scale).reshape(hd, C)        # scale folded into q
    wk = wp[:, 1].reshape(hd, C)
    wv = wp[:, 2].reshape(hd, C)
    bq = (bp[:, 0] * scale).reshape(hd, 1)        # scale folded into q bias
    bk = bp[:, 1].reshape(hd, 1)
    bv = bp[:, 2].reshape(hd, 1)
    wqkv = jnp.concatenate([wq, wk, wv], axis=0).astype(compute_dtype)  # (3*hd, C)
    bqkv = jnp.concatenate([bq, bk, bv], axis=0).astype(jnp.float32)    # (3*hd, 1)
    wo = params["out_w"].astype(compute_dtype)                          # (C, hd)
    bo = params["out_b"].reshape(C, 1).astype(jnp.float32)
    return wqkv, bqkv, wo, bo


def attention_block(x, params, *, n_heads, d_k, compute_dtype=jnp.float32):
    """x: (B, C, H, W) float32 -> (B, C, H, W).

    compute_dtype: dtype of the MXU matmul operands.  float32 everywhere is exact;
    jnp.bfloat16 is recommended on v6e/v7x (softmax and accumulation stay float32).
    """
    B, C, H, W = x.shape
    S = H * W
    hd = n_heads * d_k
    x_cs = x.reshape(B, C, S)          # channels-first / spatial-last: NO HBM transpose

    wqkv, bqkv, wo, bo = _prepare_params(
        params, n_heads=n_heads, d_k=d_k, compute_dtype=compute_dtype)

    kernel = functools.partial(_attention_kernel, n_heads=n_heads, d_k=d_k,
                               compute_dtype=compute_dtype)
    const = lambda b: (0, 0)           # constant block index -> weights stay resident

    out_cs = pl.pallas_call(
        kernel,
        out_shape=jax.ShapeDtypeStruct((B, C, S), x.dtype),
        grid_spec=pltpu.PrefetchScalarGridSpec(
            num_scalar_prefetch=0,
            grid=(B,),                                # one grid step per batch element
            in_specs=[
                pl.BlockSpec((1, C, S), lambda b: (b, 0, 0)),   # x (lane-dense in S)
                pl.BlockSpec((3 * hd, C), const),               # wqkv (fused)
                pl.BlockSpec((3 * hd, 1), const),               # bqkv
                pl.BlockSpec((C, hd), const),                   # wo
                pl.BlockSpec((C, 1), const),                    # bo
            ],
            out_specs=pl.BlockSpec((1, C, S), lambda b: (b, 0, 0)),
        ),
        compiler_params=pltpu.CompilerParams(
            dimension_semantics=("parallel",)),       # batch axis shards across TCs
    )(x_cs, wqkv, bqkv, wo, bo)

    return out_cs.reshape(B, C, H, W)


def attention_block_reference(x, params, *, n_heads, d_k):
    """Pure-JAX reference mirroring the PyTorch forward exactly."""
    B, C, H, W = x.shape
    S = H * W
    xs = jnp.transpose(x.reshape(B, C, S), (0, 2, 1))                 # (B, S, C)
    qkv = xs @ params["proj_w"].T + params["proj_b"]                  # (B, S, 3*h*dk)
    qkv = qkv.reshape(B, S, n_heads, 3 * d_k)
    q, k, v = jnp.split(qkv, 3, axis=-1)
    attn = jnp.einsum('bihd,bjhd->bijh', q, k) * (float(d_k) ** -0.5)
    attn = jax.nn.softmax(attn, axis=1)                               # dim=1 == i
    res = jnp.einsum('bijh,bjhd->bihd', attn, v)
    res = res.reshape(B, S, n_heads * d_k)
    res = res @ params["out_w"].T + params["out_b"]
    res = res + xs
    return jnp.transpose(res, (0, 2, 1)).reshape(B, C, H, W)


def init_params(key, n_channels, n_heads, d_k):
    """Deterministic synthetic init matching the module's parameter shapes."""
    k1, k2, k3, k4 = jax.random.split(key, 4)
    proj_out = n_heads * d_k * 3
    out_in = n_heads * d_k
    return {
        # nn.Linear(n_channels, n_heads*d_k*3): weight (out, in), bias (out,)
        "proj_w": jax.random.normal(k1, (proj_out, n_channels), jnp.float32) * 0.2,
        "proj_b": jax.random.normal(k2, (proj_out,), jnp.float32) * 0.1,
        # nn.Linear(n_heads*d_k, n_channels)
        "out_w": jax.random.normal(k3, (n_channels, out_in), jnp.float32) * 0.2,
        "out_b": jax.random.normal(k4, (n_channels,), jnp.float32) * 0.1,
        # GroupNorm params exist in the module but are unused in forward.
    }


if __name__ == "__main__":
    B, C, H, W = 2, 4, 16, 16
    n_heads, d_k = 2, 8

    key = jax.random.PRNGKey(0)
    kx, kp = jax.random.split(key)
    x = jax.random.normal(kx, (B, C, H, W), jnp.float32)
    params = init_params(kp, C, n_heads, d_k)

    ref = jax.block_until_ready(
        attention_block_reference(x, params, n_heads=n_heads, d_k=d_k))

    # Exact-precision (f32 MXU operands) path — the default on v5e.
    out = jax.block_until_ready(
        attention_block(x, params, n_heads=n_heads, d_k=d_k))
    assert out.shape == (B, C, H, W), out.shape
    err = float(jnp.max(jnp.abs(out - ref)))
    assert jnp.allclose(out, ref, rtol=2e-3, atol=2e-3), err

    # bf16 MXU-operand path (the v6e/v7x recommendation); softmax/accum stay f32.
    out_bf16 = jax.block_until_ready(
        attention_block(x, params, n_heads=n_heads, d_k=d_k,
                        compute_dtype=jnp.bfloat16))
    err_bf16 = float(jnp.max(jnp.abs(out_bf16 - ref)))
    assert jnp.allclose(out_bf16, ref, rtol=5e-2, atol=5e-2), err_bf16

    print("KERNEL_OK")
</pallas_src>

<mosaic_0001>
module attributes {stable_mosaic.version = 11 : i64} {
  func.func @_attention_kernel(%arg0: i32, %arg1: memref<1x4x256xf32, #tpu.memory_space<vmem>>, %arg2: memref<48x4xf32, #tpu.memory_space<vmem>>, %arg3: memref<48x1xf32, #tpu.memory_space<vmem>>, %arg4: memref<4x16xf32, #tpu.memory_space<vmem>>, %arg5: memref<4x1xf32, #tpu.memory_space<vmem>>, %arg6: memref<1x4x256xf32, #tpu.memory_space<vmem>>) attributes {dimension_semantics = [#tpu.dimension_semantics<parallel>], iteration_bounds = array<i64: 2>, scalar_prefetch = 0 : i64, scratch_operands = 0 : i64, tpu.core_type = #tpu.core_type<tc>, window_params = [{transform_indices = @transform_0, window_bounds = array<i64: 1, 4, 256>}, {pipeline_mode = #tpu.pipeline_mode<synchronous>, transform_indices = @transform_1, window_bounds = array<i64: 48, 4>}, {pipeline_mode = #tpu.pipeline_mode<synchronous>, transform_indices = @transform_2, window_bounds = array<i64: 48, 1>}, {pipeline_mode = #tpu.pipeline_mode<synchronous>, transform_indices = @transform_3, window_bounds = array<i64: 4, 16>}, {pipeline_mode = #tpu.pipeline_mode<synchronous>, transform_indices = @transform_4, window_bounds = array<i64: 4, 1>}, {transform_indices = @transform_5, window_bounds = array<i64: 1, 4, 256>}]} {
    %c0 = arith.constant 0 : index
    %c0_0 = arith.constant 0 : index
    %c0_1 = arith.constant 0 : index
    %0 = vector.load %arg1[%c0, %c0_0, %c0_1] : memref<1x4x256xf32, #tpu.memory_space<vmem>>, vector<1x4x256xf32>
    %1 = vector.shape_cast %0 : vector<1x4x256xf32> to vector<4x256xf32>
    %c0_2 = arith.constant 0 : index
    %c0_3 = arith.constant 0 : index
    %2 = vector.load %arg2[%c0_2, %c0_3] : memref<48x4xf32, #tpu.memory_space<vmem>>, vector<48x4xf32>
    %cst = arith.constant dense<0.000000e+00> : vector<48x256xf32>
    %3 = tpu.matmul %2, %1, %cst {dimension_numbers = #tpu.dot_dimension_numbers<[1], [0], [0], [1], [0, 0, 1, 1], [], []>} : vector<48x4xf32>, vector<4x256xf32>, vector<48x256xf32> -> vector<48x256xf32>
    %c0_4 = arith.constant 0 : index
    %c0_5 = arith.constant 0 : index
    %4 = vector.load %arg3[%c0_4, %c0_5] : memref<48x1xf32, #tpu.memory_space<vmem>>, vector<48x1xf32>
    %5 = vector.broadcast %4 : vector<48x1xf32> to vector<48x256xf32>
    %6 = arith.addf %3, %5 : vector<48x256xf32>
    %7 = vector.extract_strided_slice %6 {offsets = [0, 0], sizes = [16, 256], strides = [1, 1]} : vector<48x256xf32> to vector<16x256xf32>
    %8 = vector.shape_cast %7 : vector<16x256xf32> to vector<2x8x256xf32>
    %9 = vector.extract_strided_slice %6 {offsets = [16, 0], sizes = [16, 256], strides = [1, 1]} : vector<48x256xf32> to vector<16x256xf32>
    %10 = vector.shape_cast %9 : vector<16x256xf32> to vector<2x8x256xf32>
    %11 = vector.extract_strided_slice %6 {offsets = [32, 0], sizes = [16, 256], strides = [1, 1]} : vector<48x256xf32> to vector<16x256xf32>
    %12 = vector.shape_cast %11 : vector<16x256xf32> to vector<2x8x256xf32>
    %13 = tpu.transpose %8, [0, 2, 1] : vector<2x8x256xf32> -> vector<2x256x8xf32>
    "tpu.trace_start"() <{level = 10 : i32, message = "hid,hdj->hij"}> : () -> ()
    %cst_6 = arith.constant dense<0.000000e+00> : vector<2x256x256xf32>
    %14 = tpu.matmul %13, %10, %cst_6 {dimension_numbers = #tpu.dot_dimension_numbers<[2], [1], [1], [2], [0, 0, 0, 1, 1, 2], [0], [0]>} : vector<2x256x8xf32>, vector<2x8x256xf32>, vector<2x256x256xf32> -> vector<2x256x256xf32>
    "tpu.trace_stop"() : () -> ()
    %cst_7 = arith.constant dense<0xFF800000> : vector<2x256xf32>
    %15 = vector.multi_reduction <maximumf>, %14, %cst_7 [1] : vector<2x256x256xf32> to vector<2x256xf32>
    %16 = vector.shape_cast %15 : vector<2x256xf32> to vector<2x1x256xf32>
    %17 = vector.broadcast %16 : vector<2x1x256xf32> to vector<2x256x256xf32>
    %18 = arith.subf %14, %17 : vector<2x256x256xf32>
    %19 = math.exp %18 : vector<2x256x256xf32>
    %cst_8 = arith.constant dense<0.000000e+00> : vector<2x256xf32>
    %20 = vector.multi_reduction <add>, %19, %cst_8 [1] : vector<2x256x256xf32> to vector<2x256xf32>
    %21 = vector.shape_cast %20 : vector<2x256xf32> to vector<2x1x256xf32>
    %22 = tpu.reciprocal %21 {approx = true} : vector<2x1x256xf32> -> vector<2x1x256xf32>
    %23 = vector.broadcast %22 : vector<2x1x256xf32> to vector<2x256x256xf32>
    %24 = arith.mulf %19, %23 : vector<2x256x256xf32>
    "tpu.trace_start"() <{level = 10 : i32, message = "hdj,hij->hdi"}> : () -> ()
    %cst_9 = arith.constant dense<0.000000e+00> : vector<2x8x256xf32>
    %25 = tpu.matmul %12, %24, %cst_9 {dimension_numbers = #tpu.dot_dimension_numbers<[2], [2], [1], [1], [0, 0, 0, 1, 1, 1], [0], [0]>} : vector<2x8x256xf32>, vector<2x256x256xf32>, vector<2x8x256xf32> -> vector<2x8x256xf32>
    "tpu.trace_stop"() : () -> ()
    %26 = vector.shape_cast %25 : vector<2x8x256xf32> to vector<16x256xf32>
    %c0_10 = arith.constant 0 : index
    %c0_11 = arith.constant 0 : index
    %27 = vector.load %arg4[%c0_10, %c0_11] : memref<4x16xf32, #tpu.memory_space<vmem>>, vector<4x16xf32>
    %cst_12 = arith.constant dense<0.000000e+00> : vector<4x256xf32>
    %28 = tpu.matmul %27, %26, %cst_12 {dimension_numbers = #tpu.dot_dimension_numbers<[1], [0], [0], [1], [0, 0, 1, 1], [], []>} : vector<4x16xf32>, vector<16x256xf32>, vector<4x256xf32> -> vector<4x256xf32>
    %c0_13 = arith.constant 0 : index
    %c0_14 = arith.constant 0 : index
    %29 = vector.load %arg5[%c0_13, %c0_14] : memref<4x1xf32, #tpu.memory_space<vmem>>, vector<4x1xf32>
    %30 = vector.broadcast %29 : vector<4x1xf32> to vector<4x256xf32>
    %31 = arith.addf %28, %30 : vector<4x256xf32>
    %32 = arith.addf %31, %1 : vector<4x256xf32>
    %c0_15 = arith.constant 0 : index
    %c0_16 = arith.constant 0 : index
    %c0_17 = arith.constant 0 : index
    %33 = vector.load %arg6[%c0_15, %c0_16, %c0_17] : memref<1x4x256xf32, #tpu.memory_space<vmem>>, vector<1x4x256xf32>
    %34 = vector.shape_cast %33 : vector<1x4x256xf32> to vector<4x256xf32>
    %35 = vector.shape_cast %32 : vector<4x256xf32> to vector<1x4x256xf32>
    tpu.vector_store %arg6[%c0_15, %c0_16, %c0_17], %35 {strides = array<i32>} : memref<1x4x256xf32, #tpu.memory_space<vmem>>, vector<1x4x256xf32>,
    return
  }
  func.func @transform_0(%arg0: i32) -> (i32, i32, i32) {
    %c0_i32 = arith.constant 0 : i32
    %c0_i32_0 = arith.constant 0 : i32
    %c0_i32_1 = arith.constant 0 : i32
    return %arg0, %c0_i32, %c0_i32_0 : i32, i32, i32
  }
  func.func @transform_1(%arg0: i32) -> (i32, i32) {
    %c0_i32 = arith.constant 0 : i32
    %c0_i32_0 = arith.constant 0 : i32
    %c0_i32_1 = arith.constant 0 : i32
    return %c0_i32, %c0_i32_0 : i32, i32
  }
  func.func @transform_2(%arg0: i32) -> (i32, i32) {
    %c0_i32 = arith.constant 0 : i32
    %c0_i32_0 = arith.constant 0 : i32
    %c0_i32_1 = arith.constant 0 : i32
    return %c0_i32, %c0_i32_0 : i32, i32
  }
  func.func @transform_3(%arg0: i32) -> (i32, i32) {
    %c0_i32 = arith.constant 0 : i32
    %c0_i32_0 = arith.constant 0 : i32
    %c0_i32_1 = arith.constant 0 : i32
    return %c0_i32, %c0_i32_0 : i32, i32
  }
  func.func @transform_4(%arg0: i32) -> (i32, i32) {
    %c0_i32 = arith.constant 0 : i32
    %c0_i32_0 = arith.constant 0 : i32
    %c0_i32_1 = arith.constant 0 : i32
    return %c0_i32, %c0_i32_0 : i32, i32
  }
  func.func @transform_5(%arg0: i32) -> (i32, i32, i32) {
    %c0_i32 = arith.constant 0 : i32
    %c0_i32_0 = arith.constant 0 : i32
    %c0_i32_1 = arith.constant 0 : i32
    return %arg0, %c0_i32, %c0_i32_0 : i32, i32, i32
  }
}

</mosaic_0001>

<bundles_post_ra>
// kernel: tpu_custom_call.1
= control target key start
LH: loop header
LB: loop body
LE: loop exit
PB: predicated region body
PF: predicated region fallthrough
CT: control target
= control target key end

     0   :  { %10 = vsyncpa [#allocation3], 0  ;;  %s4736_s0 = inlined_call_operand.vmem [shape: f32[2,4,256], index: 0, kind: input, shape index: {}]   ;;  %s4737_s1 = inlined_call_operand.vmem [shape: f32[48,4], index: 1, kind: input, shape index: {}]   ;;  %s4738_s2 = inlined_call_operand.vmem [shape: f32[48,1], index: 2, kind: input, shape index: {}]   ;;  %s4739_s3 = inlined_call_operand.vmem [shape: f32[4,16], index: 3, kind: input, shape index: {}]   ;;  %s4740_s4 = inlined_call_operand.vmem [shape: f32[4,1], index: 4, kind: input, shape index: {}]   ;;  %s4741_s5 = inlined_call_operand.hbm [shape: f32[2,4,256], index: 5, kind: output, shape index: {}]  }
   0x1   :  { %12 = vsyncpa [#allocation3 + $0x1], 0  ;;  %s2839_s18 = smov 0   ;;  %s2841_s19 = smov 0  }
   0x2   :  { %s2843_s20 = smov 0   ;;  %s2845_s21 = smov 0  }
   0x3 LB: > { %s2860_s22 = sadd.s32 4294967295, %s2804_s21   ;;  %s2346_s23 = sadd.s32 4294967294, %s2804_s21   ;;  %s2804_s21 = sphi %s2845_s21, %s5302_s21   ;;  %s2800_s20 = sphi %s2843_s20, %s5301_s20   ;;  %s2796_s19 = sphi %s2841_s19, %s5300_s19   ;;  %s2792_s18 = sphi %s2839_s18, %s5299_s18  }
   0x4   : > { %s2864_s24 = sadd.s32 1, %s2804_s21   ;;  %s135_s25 = sadd.s32 1, %s2800_s20 }
   0x5   : > { %s132_s26 = ssub.s32 %s2804_s21, %s2864_s24  ;;  %p145_p0 = scmp.ne.s32.totalorder %s2800_s20, %s2796_s19 }
   0x6   : > { %p133_p1 = scmp.eq.s32.totalorder %s132_s26, 0  ;;  %p146_p2 = scmp.eq.s32.totalorder %s2860_s22, 1 }
   0x7   : > { %p151_p3 = scmp.ne.s32.totalorder %s2796_s19, %s2792_s18  ;;  %p152_p4 = scmp.eq.s32.totalorder %s2346_s23, 1 }
   0x8   : > { %s2875_s27 = scalar_select %p133_p1, %s2800_s20, %s135_s25  }
   0x9   : > { %p2877_p5 = por %p146_p2, %p145_p0  ;;  %p2881_p6 = por %p152_p4, %p151_p3 }
   0xa   : > { %p2349_p7 = scmp.ge.s32.totalorder %s2804_s21, 1  ;;  %p190_p8 = scmp.lt.s32.totalorder %s2804_s21, 3 }
   0xc   : > { %p191_p9 = pnand %p2349_p7, %p190_p8 }
   0xe   : > { %194 = sbr.rel (%p191_p9) target bundleno = 1428 (0x594), region = 40 }
  0x13   : > { %p218_p10 = scmp.lt.s32.totalorder %s2860_s22, 1  ;;  %v4742_v0 = vmov 0.0   ;;  %v231_v1 = vld [vmem:[%s4738_s2 + $0x8] sm:$0xff]  ;;  %v2807_v2 = vmov 0   ;;  %v233_v3 = vld [vmem:[%s4738_s2 + $0x18] sm:$0xff]  ;;  %v230_v4 = vld [vmem:[%s4738_s2] sm:$0xff] }
  0x14   : > { %356 = vmatprep.mubr.f32.mxu0 %v4742_v0  ;;  %380 = vmatprep.mubr.f32.mxu1 %v4742_v0  ;;  %v232_v5 = vld [vmem:[%s4738_s2 + $0x10] sm:$0xff]  ;;  %vm287_vm0 = vcmask 1043456   ;;  %v224_v8 = vld [vmem:[%s4737_s1] sm:$0xff]  ;;  %vm268_vm1 = vcmask 31744   ;;  %v225_v9 = vld [vmem:[%s4737_s1 + $0x8] sm:$0xff]  ;;  %vm521_vm2 = vcmask 64512  }
  0x15   : > { %s219_s7 = scalar_select %p218_p10, %s2860_s22, 1  ;;  %2476 = vset.pattern.permute.xlu0 %v2807_v2  ;;  %2477 = vset.pattern.permute.xlu1 %v2807_v2  ;;  %v226_v10 = vld [vmem:[%s4737_s1 + $0x10] sm:$0xff]  ;;  %v227_v11 = vld [vmem:[%s4737_s1 + $0x18] sm:$0xff]  ;;  %v228_v12 = vld [vmem:[%s4737_s1 + $0x20] sm:$0xff]  ;;  %vm2189_vm3 = vcmask 130048  }
  0x16   : > { %243 = vperm.xlu0 %2476, %v231_v1   ;;  %253 = vperm.xlu1 %2477, %v233_v3   ;;  %v229_v13 = vld [vmem:[%s4737_s1 + $0x28] sm:$0xff]  ;;  %v234_v47 = vld [vmem:[%s4738_s2 + $0x20] sm:$0xff]  ;;  %s2432_s9 = sshll.u32 %s2860_s22, 7  ;;  %s2808_s22 = smov [#allocation2]  }
  0x17   : > { %s2431_s10 = sshll.u32 %s219_s7, 3  ;;  %v235_v54 = vld [vmem:[%s4738_s2 + $0x28] sm:$0xff]  ;;  %v2183_v57 = vld [vmem:[%s4740_s4] sm:$0xf]  ;;  %s215_s7 = sand.u32 1, %s2796_s19  }
  0x18   : > { %s2906_s17 = scalar_lea.vmem %s4736_s0, %s2431_s10  ;;  %s2350_s8 = sshll.u32 %s215_s7, 3 }
  0x19   : > { %v223_v6 = vld [vmem:[%s2906_s17] sm:$0xff]  ;;  %s217_s10 = scalar_lea.vmem [#allocation2], %s2350_s8  ;;  %s2285_s14 = scalar_lea.hbm %s4741_s5, %s2432_s9 }
  0x1a   : > { %v2909_v7 = vcombine.high %v223_v6, %v223_v6  ;;  %238 = vperm.xlu0 %2476, %v230_v4   ;;  %248 = vperm.xlu1 %2477, %v232_v5   ;;  %s2287_s11 = sshll.u32 %s217_s10, 4  ;;  %s2273_s15 = scalar_lea.sflag [#allocation3], %s215_s7  ;;  %s2288_s11 = int_to_ptr.vmem [resolvable:$true] %s2287_s11 }
  0x1b   : > { %s2744_s16 = scalar_lea.vmem %s2288_s11, 128  ;;  %s2748_s23 = sshll.u32 %s2808_s22, 4  ;;  %s2749_s23 = int_to_ptr.vmem [resolvable:$false] %s2748_s23 }
  0x1c   : > { %4905 = vst [vmem:[#allocation5_spill] sm:$0xff] %v2909_v7  ;;  %2353 = vmatprep.subr.msk.mxu0 %vm287_vm0, %v2909_v7  ;;  %2433 = vmatprep.subr.msk.mxu1 %vm287_vm0, %v2909_v7  ;;  %p2745_p11 = scmp.ne.s32.totalorder %s2288_s11, %s2744_s16  ;;  %p2751_p0 = scmp.lt.s32.totalorder %s2288_s11, %s2749_s23 }
  0x1d   : > { %2354 = vmatpush1.msk.msra.mxu0 %vm287_vm0, %v223_v6  ;;  %2434 = vmatpush1.msk.msra.mxu1 %vm287_vm0, %v223_v6 }
  0x1e   : > { %2355 = vmatmul.mubr.msk.f32.vlgmr.msra.gmra.mxu0 %vm268_vm1, %v224_v8  ;;  %2359 = vmatmul.mubr.msk.f32.vlgmr.msra.gmra.mxu1 %vm268_vm1, %v228_v12  ;;  %p2746_p12 = pnand %p2745_p11, %p2877_p5 }
  0x1f   : > { %362 = vmatprep.mubr.f32.mxu0 %v4742_v0  ;;  %386 = vmatprep.mubr.f32.mxu1 %v4742_v0 }
  0x20   : > { %p2747_p13 = pneg %p2746_p12 }
  0x22   : > { %2356 = vmatmul.mubr.msk.f32.gmra.mxu0 %vm268_vm1, %v225_v9  ;;  %2360 = vmatmul.mubr.msk.f32.gmra.mxu1 %vm268_vm1, %v229_v13 }
  0x23   : > { %368 = vmatprep.mubr.f32.mxu0 %v4742_v0  ;;  %682 = vmatprep.mubr.f32.mxu1 %v4742_v0 }
  0x26   : > { %2357 = vmatmul.mubr.msk.f32.gmra.mxu0 %vm268_vm1, %v226_v10 }
  0x27   : > { %374 = vmatprep.mubr.f32.mxu0 %v4742_v0 }
  0x2a   : > { %2358 = vmatmul.mubr.msk.f32.gmra.mxu0 %vm268_vm1, %v227_v11 }
  0x2b   : > { %1035 = vmatprep.mubr.f32.mxu0 %v4742_v0 }
  0x91   : > { %v244_v14 = vpop.permute.xlu0 %243  ;;  %v254_v18 = vpop.permute.xlu1 %253 }
  0x95   : > { %v239_v15 = vpop.permute.xlu0 %238  ;;  %v249_v23 = vpop.permute.xlu1 %248 }
  0xde   : > { %v358_v16 = vpop.f32.mrf.mxu0 }
  0xdf   : > { %v359_v17 = vadd.f32 %v358_v16, %v239_v15 }
  0xe0   : > { %v360_v19 = vpop.f32.mrf.mxu0 }
  0xe1   : > { %393 = vxpose.xlu1.b32.start.end [1/1] (short) %v359_v17, 128  ;;  %v361_v32 = vadd.f32 %v360_v19, %v239_v15 }
  0xe2   : > { %v364_v20 = vpop.f32.mrf.mxu0 }
  0xe3   : > { %v365_v21 = vadd.f32 %v364_v20, %v244_v14 }
  0xe4   : > { %v366_v22 = vpop.f32.mrf.mxu0 }
  0xe5   : > { %457 = vxpose.xlu0.b32.start.end [1/1] (short) %v365_v21, 128  ;;  %v367_v33 = vadd.f32 %v366_v22, %v244_v14 }
  0xe6   : > { %v370_v24 = vpop.f32.mrf.mxu0 }
  0xe7   : > { %v371_v26 = vadd.f32 %v370_v24, %v249_v23 }
  0xe8   : > { %v372_v25 = vpop.f32.mrf.mxu0 }
  0xe9   : > { %v373_v27 = vadd.f32 %v372_v25, %v249_v23 }
  0xea   : > { %v376_v28 = vpop.f32.mrf.mxu0 }
  0xeb   : > { %648 = vmatprep.subr.mxu1 %v373_v27  ;;  %v377_v29 = vadd.f32 %v376_v28, %v254_v18 }
  0xec   : > { %v378_v30 = vpop.f32.mrf.mxu0  ;;  %649 = vmatpush1.msra.mxu1 %v371_v26 }
  0xed   : > { %v379_v31 = vadd.f32 %v378_v30, %v254_v18 }
  0xef   : > { %1001 = vmatprep.subr.mxu0 %v379_v31 }
  0xf0   : > { %1002 = vmatpush1.msra.mxu0 %v377_v29 }
 0x11e   : > { %425 = vxpose.xlu1.b32.start.end [1/1] (short) %v361_v32, 128 }
 0x122   : > { %489 = vxpose.xlu0.b32.start.end [1/1] (short) %v367_v33, 128 }
 0x15d   : > { %v409_v34 = vpop.trf.xlu1 }
 0x15e   : > { %2361 = vmatmul.mubr.msk.f32.vlgmr.msra.gmra.mxu1 %vm521_vm2, %v409_v34 }
 0x15f   : > { %688 = vmatprep.mubr.f32.mxu1 %v4742_v0 }
 0x161   : > { %v473_v35 = vpop.trf.xlu0  ;;  %v410_v36 = vpop.trf.xlu1 }
 0x162   : > { %2362 = vmatmul.mubr.msk.f32.gmra.mxu1 %vm521_vm2, %v410_v36  ;;  %2393 = vmatmul.mubr.msk.f32.vlgmr.msra.gmra.mxu0 %vm521_vm2, %v473_v35 }
 0x163   : > { %1041 = vmatprep.mubr.f32.mxu0 %v4742_v0  ;;  %694 = vmatprep.mubr.f32.mxu1 %v4742_v0 }
 0x165   : > { %v474_v37 = vpop.trf.xlu0  ;;  %v411_v38 = vpop.trf.xlu1 }
 0x166   : > { %2363 = vmatmul.mubr.msk.f32.gmra.mxu1 %vm521_vm2, %v411_v38  ;;  %2394 = vmatmul.mubr.msk.f32.gmra.mxu0 %vm521_vm2, %v474_v37 }
 0x167   : > { %1047 = vmatprep.mubr.f32.mxu0 %v4742_v0  ;;  %700 = vmatprep.mubr.f32.mxu1 %v4742_v0 }
 0x169   : > { %v475_v39 = vpop.trf.xlu0  ;;  %v412_v40 = vpop.trf.xlu1 }
 0x16a   : > { %2364 = vmatmul.mubr.msk.f32.gmra.mxu1 %vm521_vm2, %v412_v40  ;;  %2395 = vmatmul.mubr.msk.f32.gmra.mxu0 %vm521_vm2, %v475_v39  ;;  %v3078_v39 = vpop.f32.mrf.mxu1 }
 0x16b   : > { %1053 = vmatprep.mubr.f32.mxu0 %v4742_v0  ;;  %706 = vmatprep.mubr.f32.mxu1 %v4742_v0  ;;  %4906 = vst [vmem:[#allocation6_spill] sm:$0xff] %v3078_v39 }
 0x16c   : > { %v384_v40 = vpop.f32.mrf.mxu1 }
 0x16d   : > { %v476_v41 = vpop.trf.xlu0  ;;  %v413_v42 = vpop.trf.xlu1 }
 0x16e   : > { %2365 = vmatmul.mubr.msk.f32.gmra.mxu1 %vm521_vm2, %v413_v42  ;;  %2396 = vmatmul.mubr.msk.f32.gmra.mxu0 %vm521_vm2, %v476_v41 }
 0x16f   : > { %1059 = vmatprep.mubr.f32.mxu0 %v4742_v0  ;;  %712 = vmatprep.mubr.f32.mxu1 %v4742_v0 }
 0x171   : > { %v477_v43 = vpop.trf.xlu0  ;;  %v414_v44 = vpop.trf.xlu1 }
 0x172   : > { %2366 = vmatmul.mubr.msk.f32.gmra.mxu1 %vm521_vm2, %v414_v44  ;;  %2397 = vmatmul.mubr.msk.f32.gmra.mxu0 %vm521_vm2, %v477_v43  ;;  %v3083_v43 = vpop.f32.mrf.mxu1 }
 0x173   : > { %1065 = vmatprep.mubr.f32.mxu0 %v4742_v0  ;;  %718 = vmatprep.mubr.f32.mxu1 %v4742_v0  ;;  %4908 = vst [vmem:[#allocation8_spill] sm:$0xff] %v3083_v43 }
 0x174   : > { %v390_v44 = vpop.f32.mrf.mxu1 }
 0x175   : > { %v478_v45 = vpop.trf.xlu0  ;;  %v415_v46 = vpop.trf.xlu1 }
 0x176   : > { %2367 = vmatmul.mubr.msk.f32.gmra.mxu1 %vm521_vm2, %v415_v46  ;;  %2398 = vmatmul.mubr.msk.f32.gmra.mxu0 %vm521_vm2, %v478_v45 }
 0x177   : > { %1071 = vmatprep.mubr.f32.mxu0 %v4742_v0  ;;  %724 = vmatprep.mubr.f32.mxu1 %v4742_v0 }
 0x178   : > { %258 = vperm.xlu1 %2477, %v234_v47  }
 0x179   : > { %v479_v48 = vpop.trf.xlu0  ;;  %v416_v49 = vpop.trf.xlu1 }
 0x17a   : > { %2368 = vmatmul.mubr.msk.f32.gmra.mxu1 %vm521_vm2, %v416_v49  ;;  %2399 = vmatmul.mubr.msk.f32.gmra.mxu0 %vm521_vm2, %v479_v48 }
 0x17b   : > { %1077 = vmatprep.mubr.f32.mxu0 %v4742_v0  ;;  %730 = vmatprep.mubr.f32.mxu1 %v4742_v0 }
 0x17d   : > { %v480_v50 = vpop.trf.xlu0  ;;  %v417_v51 = vpop.trf.xlu1 }
 0x17e   : > { %2369 = vmatmul.mubr.msk.f32.gmra.mxu1 %vm521_vm2, %v417_v51  ;;  %2400 = vmatmul.mubr.msk.f32.gmra.mxu0 %vm521_vm2, %v480_v50 }
 0x17f   : > { %1083 = vmatprep.mubr.f32.mxu0 %v4742_v0  ;;  %736 = vmatprep.mubr.f32.mxu1 %v4742_v0 }
 0x181   : > { %v481_v52 = vpop.trf.xlu0  ;;  %v418_v53 = vpop.trf.xlu1 }
 0x182   : > { %2370 = vmatmul.mubr.msk.f32.gmra.mxu1 %vm521_vm2, %v418_v53  ;;  %2401 = vmatmul.mubr.msk.f32.gmra.mxu0 %vm521_vm2, %v481_v52 }
 0x183   : > { %1089 = vmatprep.mubr.f32.mxu0 %v4742_v0  ;;  %742 = vmatprep.mubr.f32.mxu1 %v4742_v0 }
 0x185   : > { %v482_v55 = vpop.trf.xlu0  ;;  %v419_v56 = vpop.trf.xlu1 }
 0x186   : > { %2371 = vmatmul.mubr.msk.f32.gmra.mxu1 %vm521_vm2, %v419_v56  ;;  %2402 = vmatmul.mubr.msk.f32.gmra.mxu0 %vm521_vm2, %v482_v55 }
 0x187   : > { %263 = vperm.xlu0 %2476, %v235_v54   ;;  %1095 = vmatprep.mubr.f32.mxu0 %v4742_v0 }
 0x188   : > { %748 = vmatprep.mubr.f32.mxu1 %v4742_v0 }
 0x189   : > { %v483_v58 = vpop.trf.xlu0  ;;  %v420_v59 = vpop.trf.xlu1 }
 0x18a   : > { %2372 = vmatmul.mubr.msk.f32.gmra.mxu1 %vm521_vm2, %v420_v59  ;;  %2403 = vmatmul.mubr.msk.f32.gmra.mxu0 %vm521_vm2, %v483_v58 }
 0x18b   : > { %2186 = vperm.xlu0 %2476, %v2183_v57   ;;  %1101 = vmatprep.mubr.f32.mxu0 %v4742_v0 }
 0x18c   : > { %754 = vmatprep.mubr.f32.mxu1 %v4742_v0 }
 0x18d   : > { %v484_v60 = vpop.trf.xlu0  ;;  %v421_v61 = vpop.trf.xlu1 }
 0x18e   : > { %2373 = vmatmul.mubr.msk.f32.gmra.mxu1 %vm521_vm2, %v421_v61  ;;  %2404 = vmatmul.mubr.msk.f32.gmra.mxu0 %vm521_vm2, %v484_v60 }
 0x18f   : > { %1107 = vmatprep.mubr.f32.mxu0 %v4742_v0  ;;  %760 = vmatprep.mubr.f32.mxu1 %v4742_v0 }
 0x191   : > { %v485_v62 = vpop.trf.xlu0  ;;  %v422_v63 = vpop.trf.xlu1 }
 0x192   : > { %2374 = vmatmul.mubr.msk.f32.gmra.mxu1 %vm521_vm2, %v422_v63  ;;  %2405 = vmatmul.mubr.msk.f32.gmra.mxu0 %vm521_vm2, %v485_v62 }
 0x193   : > { %1113 = vmatprep.mubr.f32.mxu0 %v4742_v0  ;;  %766 = vmatprep.mubr.f32.mxu1 %v4742_v0 }
 0x195   : > { %v486_v1 = vpop.trf.xlu0  ;;  %v423_v2 = vpop.trf.xlu1 }
 0x196   : > { %2375 = vmatmul.mubr.msk.f32.gmra.mxu1 %vm521_vm2, %v423_v2  ;;  %2406 = vmatmul.mubr.msk.f32.gmra.mxu0 %vm521_vm2, %v486_v1 }
 0x197   : > { %1119 = vmatprep.mubr.f32.mxu0 %v4742_v0  ;;  %772 = vmatprep.mubr.f32.mxu1 %v4742_v0 }
 0x199   : > { %v487_v3 = vpop.trf.xlu0  ;;  %v424_v4 = vpop.trf.xlu1 }
 0x19a   : > { %2376 = vmatmul.mubr.msk.f32.gmra.mxu1 %vm521_vm2, %v424_v4  ;;  %2407 = vmatmul.mubr.msk.f32.gmra.mxu0 %vm521_vm2, %v487_v3 }
 0x19b   : > { %1125 = vmatprep.mubr.f32.mxu0 %v4742_v0  ;;  %778 = vmatprep.mubr.f32.mxu1 %v4742_v0 }
 0x19d   : > { %v488_v5 = vpop.trf.xlu0  ;;  %v441_v6 = vpop.trf.xlu1 }
 0x19e   : > { %2377 = vmatmul.mubr.msk.f32.gmra.mxu1 %vm521_vm2, %v441_v6  ;;  %2408 = vmatmul.mubr.msk.f32.gmra.mxu0 %vm521_vm2, %v488_v5 }
 0x19f   : > { %1131 = vmatprep.mubr.f32.mxu0 %v4742_v0  ;;  %784 = vmatprep.mubr.f32.mxu1 %v4742_v0 }
 0x1a1   : > { %v505_v8 = vpop.trf.xlu0  ;;  %v442_v9 = vpop.trf.xlu1 }
 0x1a2   : > { %2378 = vmatmul.mubr.msk.f32.gmra.mxu1 %vm521_vm2, %v442_v9  ;;  %2409 = vmatmul.mubr.msk.f32.gmra.mxu0 %vm521_vm2, %v505_v8 }
 0x1a3   : > { %1137 = vmatprep.mubr.f32.mxu0 %v4742_v0  ;;  %790 = vmatprep.mubr.f32.mxu1 %v4742_v0 }
 0x1a5   : > { %v506_v10 = vpop.trf.xlu0  ;;  %v443_v11 = vpop.trf.xlu1 }
 0x1a6   : > { %2379 = vmatmul.mubr.msk.f32.gmra.mxu1 %vm521_vm2, %v443_v11  ;;  %2410 = vmatmul.mubr.msk.f32.gmra.mxu0 %vm521_vm2, %v506_v10 }
 0x1a7   : > { %1143 = vmatprep.mubr.f32.mxu0 %v4742_v0  ;;  %796 = vmatprep.mubr.f32.mxu1 %v4742_v0 }
 0x1a9   : > { %v507_v12 = vpop.trf.xlu0  ;;  %v444_v13 = vpop.trf.xlu1 }
 0x1aa   : > { %2380 = vmatmul.mubr.msk.f32.gmra.mxu1 %vm521_vm2, %v444_v13  ;;  %2411 = vmatmul.mubr.msk.f32.gmra.mxu0 %vm521_vm2, %v507_v12 }
 0x1ab   : > { %1149 = vmatprep.mubr.f32.mxu0 %v4742_v0  ;;  %802 = vmatprep.mubr.f32.mxu1 %v4742_v0 }
 0x1ad   : > { %v508_v14 = vpop.trf.xlu0  ;;  %v445_v15 = vpop.trf.xlu1 }
 0x1ae   : > { %2381 = vmatmul.mubr.msk.f32.gmra.mxu1 %vm521_vm2, %v445_v15  ;;  %2412 = vmatmul.mubr.msk.f32.gmra.mxu0 %vm521_vm2, %v508_v14 }
 0x1af   : > { %1155 = vmatprep.mubr.f32.mxu0 %v4742_v0  ;;  %808 = vmatprep.mubr.f32.mxu1 %v4742_v0 }
 0x1b1   : > { %v509_v16 = vpop.trf.xlu0  ;;  %v446_v17 = vpop.trf.xlu1 }
 0x1b2   : > { %2382 = vmatmul.mubr.msk.f32.gmra.mxu1 %vm521_vm2, %v446_v17  ;;  %2413 = vmatmul.mubr.msk.f32.gmra.mxu0 %vm521_vm2, %v509_v16 }
 0x1b3   : > { %1161 = vmatprep.mubr.f32.mxu0 %v4742_v0  ;;  %814 = vmatprep.mubr.f32.mxu1 %v4742_v0 }
 0x1b5   : > { %v510_v18 = vpop.trf.xlu0  ;;  %v447_v19 = vpop.trf.xlu1 }
 0x1b6   : > { %2383 = vmatmul.mubr.msk.f32.gmra.mxu1 %vm521_vm2, %v447_v19  ;;  %2414 = vmatmul.mubr.msk.f32.gmra.mxu0 %vm521_vm2, %v510_v18 }
 0x1b7   : > { %1167 = vmatprep.mubr.f32.mxu0 %v4742_v0  ;;  %820 = vmatprep.mubr.f32.mxu1 %v4742_v0 }
 0x1b9   : > { %v511_v20 = vpop.trf.xlu0  ;;  %v448_v21 = vpop.trf.xlu1 }
 0x1ba   : > { %2384 = vmatmul.mubr.msk.f32.gmra.mxu1 %vm521_vm2, %v448_v21  ;;  %2415 = vmatmul.mubr.msk.f32.gmra.mxu0 %vm521_vm2, %v511_v20 }
 0x1bb   : > { %1173 = vmatprep.mubr.f32.mxu0 %v4742_v0  ;;  %826 = vmatprep.mubr.f32.mxu1 %v4742_v0 }
 0x1bd   : > { %v512_v22 = vpop.trf.xlu0  ;;  %v449_v23 = vpop.trf.xlu1 }
 0x1be   : > { %2385 = vmatmul.mubr.msk.f32.gmra.mxu1 %vm521_vm2, %v449_v23  ;;  %2416 = vmatmul.mubr.msk.f32.gmra.mxu0 %vm521_vm2, %v512_v22 }
 0x1bf   : > { %1179 = vmatprep.mubr.f32.mxu0 %v4742_v0  ;;  %832 = vmatprep.mubr.f32.mxu1 %v4742_v0 }
 0x1c1   : > { %v513_v24 = vpop.trf.xlu0  ;;  %v450_v25 = vpop.trf.xlu1 }
 0x1c2   : > { %2386 = vmatmul.mubr.msk.f32.gmra.mxu1 %vm521_vm2, %v450_v25  ;;  %2417 = vmatmul.mubr.msk.f32.gmra.mxu0 %vm521_vm2, %v513_v24 }
 0x1c3   : > { %1185 = vmatprep.mubr.f32.mxu0 %v4742_v0  ;;  %838 = vmatprep.mubr.f32.mxu1 %v4742_v0 }
 0x1c5   : > { %v514_v26 = vpop.trf.xlu0  ;;  %v451_v27 = vpop.trf.xlu1 }
 0x1c6   : > { %2387 = vmatmul.mubr.msk.f32.gmra.mxu1 %vm521_vm2, %v451_v27  ;;  %2418 = vmatmul.mubr.msk.f32.gmra.mxu0 %vm521_vm2, %v514_v26 }
 0x1c7   : > { %1191 = vmatprep.mubr.f32.mxu0 %v4742_v0  ;;  %844 = vmatprep.mubr.f32.mxu1 %v4742_v0 }
 0x1c9   : > { %v515_v28 = vpop.trf.xlu0  ;;  %v452_v29 = vpop.trf.xlu1 }
 0x1ca   : > { %2388 = vmatmul.mubr.msk.f32.gmra.mxu1 %vm521_vm2, %v452_v29  ;;  %2419 = vmatmul.mubr.msk.f32.gmra.mxu0 %vm521_vm2, %v515_v28 }
 0x1cb   : > { %1197 = vmatprep.mubr.f32.mxu0 %v4742_v0  ;;  %850 = vmatprep.mubr.f32.mxu1 %v4742_v0 }
 0x1cd   : > { %v516_v30 = vpop.trf.xlu0  ;;  %v453_v31 = vpop.trf.xlu1 }
 0x1ce   : > { %2389 = vmatmul.mubr.msk.f32.gmra.mxu1 %vm521_vm2, %v453_v31  ;;  %2420 = vmatmul.mubr.msk.f32.gmra.mxu0 %vm521_vm2, %v516_v30 }
 0x1cf   : > { %1203 = vmatprep.mubr.f32.mxu0 %v4742_v0  ;;  %856 = vmatprep.mubr.f32.mxu1 %v4742_v0 }
 0x1d1   : > { %v517_v32 = vpop.trf.xlu0  ;;  %v454_v33 = vpop.trf.xlu1 }
 0x1d2   : > { %2390 = vmatmul.mubr.msk.f32.gmra.mxu1 %vm521_vm2, %v454_v33  ;;  %2421 = vmatmul.mubr.msk.f32.gmra.mxu0 %vm521_vm2, %v517_v32 }
 0x1d3   : > { %1209 = vmatprep.mubr.f32.mxu0 %v4742_v0  ;;  %862 = vmatprep.mubr.f32.mxu1 %v4742_v0 }
 0x1d5   : > { %v518_v34 = vpop.trf.xlu0  ;;  %v455_v35 = vpop.trf.xlu1 }
 0x1d6   : > { %2391 = vmatmul.mubr.msk.f32.gmra.mxu1 %vm521_vm2, %v455_v35  ;;  %2422 = vmatmul.mubr.msk.f32.gmra.mxu0 %vm521_vm2, %v518_v34 }
 0x1d7   : > { %1215 = vmatprep.mubr.f32.mxu0 %v4742_v0  ;;  %868 = vmatprep.mubr.f32.mxu1 %v4742_v0 }
 0x1d9   : > { %v519_v36 = vpop.trf.xlu0  ;;  %v456_v37 = vpop.trf.xlu1 }
 0x1da   : > { %2392 = vmatmul.mubr.msk.f32.gmra.mxu1 %vm521_vm2, %v456_v37  ;;  %2423 = vmatmul.mubr.msk.f32.gmra.mxu0 %vm521_vm2, %v519_v36 }
 0x1db   : > { %1221 = vmatprep.mubr.f32.mxu0 %v4742_v0 }
 0x1dd   : > { %v520_v38 = vpop.trf.xlu0 }
 0x1de   : > { %2424 = vmatmul.mubr.msk.f32.gmra.mxu0 %vm521_vm2, %v520_v38 }
 0x1f3   : > { %v3080_v41 = vpop.permute.xlu1 %258 }
 0x1f4   : > { %4907 = vst [vmem:[#allocation7_spill] sm:$0xff] %v3080_v41  ;;  %v385_v42 = vadd.f32 %v384_v40, %v3080_v41 }
 0x1f6   : > { %2104 = vmatprep.mubr.f32.mxu1 %v385_v42 }
 0x202   : > { %v3085_v45 = vpop.permute.xlu0 %263 }
 0x203   : > { %4909 = vst [vmem:[#allocation9_spill] sm:$0xff] %v3085_v45  ;;  %v391_v46 = vadd.f32 %v390_v44, %v3085_v45 }
 0x205   : > { %2175 = vmatprep.mubr.f32.mxu0 %v391_v46 }
 0x21e   : > { %v3088_v47 = vpop.f32.mrf.mxu1 }
 0x21f   : > { %4910 = vst [vmem:[#allocation10_spill] sm:$0xff] %v3088_v47 }
 0x220   : > { %v3090_v48 = vpop.f32.mrf.mxu1 }
 0x221   : > { %4911 = vst [vmem:[#allocation11_spill] sm:$0xff] %v3090_v48 }
 0x222   : > { %v3092_v49 = vpop.f32.mrf.mxu1  ;;  %v3094_v50 = vpop.f32.mrf.mxu0 }
 0x223   : > { %4912 = vst [vmem:[#allocation12_spill] sm:$0xff] %v3092_v49  ;;  %4913 = vst [vmem:[#allocation13_spill] sm:$0xff] %v3094_v50  ;;  %v1228_v39 = vmax.f32 %v3088_v47, %v3092_v49 }
 0x224   : > { %v3096_v51 = vpop.f32.mrf.mxu1  ;;  %v3098_v52 = vpop.f32.mrf.mxu0 }
 0x225   : > { %4914 = vst [vmem:[#allocation14_spill] sm:$0xff] %v3096_v51  ;;  %4915 = vst [vmem:[#allocation15_spill] sm:$0xff] %v3098_v52 }
 0x226   : > { %v3100_v53 = vpop.f32.mrf.mxu1  ;;  %v3102_v54 = vpop.f32.mrf.mxu0 }
 0x227   : > { %4916 = vst [vmem:[#allocation16_spill] sm:$0xff] %v3100_v53  ;;  %4917 = vst [vmem:[#allocation17_spill] sm:$0xff] %v3102_v54 }
 0x228   : > { %v3104_v55 = vpop.f32.mrf.mxu1  ;;  %v3106_v56 = vpop.f32.mrf.mxu0 }
 0x229   : > { %4918 = vst [vmem:[#allocation18_spill] sm:$0xff] %v3104_v55  ;;  %4919 = vst [vmem:[#allocation19_spill] sm:$0xff] %v3106_v56 }
 0x22a   : > { %v3108_v57 = vpop.f32.mrf.mxu1  ;;  %v3110_v58 = vpop.f32.mrf.mxu0 }
 0x22b   : > { %4920 = vst [vmem:[#allocation20_spill] sm:$0xff] %v3108_v57  ;;  %4921 = vst [vmem:[#allocation21_spill] sm:$0xff] %v3110_v58 }
 0x22c   : > { %v3112_v59 = vpop.f32.mrf.mxu1  ;;  %v3114_v60 = vpop.f32.mrf.mxu0 }
 0x22d   : > { %4922 = vst [vmem:[#allocation22_spill] sm:$0xff] %v3112_v59  ;;  %4923 = vst [vmem:[#allocation23_spill] sm:$0xff] %v3114_v60 }
 0x22e   : > { %v3116_v61 = vpop.f32.mrf.mxu1  ;;  %v3118_v62 = vpop.f32.mrf.mxu0 }
 0x22f   : > { %4924 = vst [vmem:[#allocation24_spill] sm:$0xff] %v3116_v61  ;;  %4925 = vst [vmem:[#allocation25_spill] sm:$0xff] %v3118_v62 }
 0x230   : > { %v3120_v63 = vpop.f32.mrf.mxu1  ;;  %v3122_v1 = vpop.f32.mrf.mxu0 }
 0x231   : > { %4926 = vst [vmem:[#allocation26_spill] sm:$0xff] %v3120_v63  ;;  %4927 = vst [vmem:[#allocation27_spill] sm:$0xff] %v3122_v1 }
 0x232   : > { %v3124_v2 = vpop.f32.mrf.mxu1  ;;  %v3126_v3 = vpop.f32.mrf.mxu0 }
 0x233   : > { %4928 = vst [vmem:[#allocation28_spill] sm:$0xff] %v3124_v2  ;;  %4929 = vst [vmem:[#allocation29_spill] sm:$0xff] %v3126_v3 }
 0x234   : > { %v3128_v4 = vpop.f32.mrf.mxu1  ;;  %v3130_v5 = vpop.f32.mrf.mxu0 }
 0x235   : > { %4930 = vst [vmem:[#allocation30_spill] sm:$0xff] %v3128_v4  ;;  %4931 = vst [vmem:[#allocation31_spill] sm:$0xff] %v3130_v5 }
 0x236   : > { %v3132_v6 = vpop.f32.mrf.mxu1  ;;  %v3134_v8 = vpop.f32.mrf.mxu0 }
 0x237   : > { %4932 = vst [vmem:[#allocation32_spill] sm:$0xff] %v3132_v6  ;;  %4933 = vst [vmem:[#allocation33_spill] sm:$0xff] %v3134_v8 }
 0x238   : > { %v3136_v9 = vpop.f32.mrf.mxu1  ;;  %v3138_v10 = vpop.f32.mrf.mxu0 }
 0x239   : > { %4934 = vst [vmem:[#allocation34_spill] sm:$0xff] %v3136_v9  ;;  %4935 = vst [vmem:[#allocation35_spill] sm:$0xff] %v3138_v10 }
 0x23a   : > { %v3140_v11 = vpop.f32.mrf.mxu1  ;;  %v3142_v12 = vpop.f32.mrf.mxu0 }
 0x23b   : > { %4936 = vst [vmem:[#allocation36_spill] sm:$0xff] %v3140_v11  ;;  %4937 = vst [vmem:[#allocation37_spill] sm:$0xff] %v3142_v12 }
 0x23c   : > { %v3144_v13 = vpop.f32.mrf.mxu1  ;;  %v3146_v14 = vpop.f32.mrf.mxu0 }
 0x23d   : > { %4938 = vst [vmem:[#allocation38_spill] sm:$0xff] %v3144_v13  ;;  %4939 = vst [vmem:[#allocation39_spill] sm:$0xff] %v3146_v14 }
 0x23e   : > { %v3148_v15 = vpop.f32.mrf.mxu1  ;;  %v3150_v16 = vpop.f32.mrf.mxu0 }
 0x23f   : > { %4940 = vst [vmem:[#allocation40_spill] sm:$0xff] %v3148_v15  ;;  %4941 = vst [vmem:[#allocation41_spill] sm:$0xff] %v3150_v16 }
 0x240   : > { %v3152_v17 = vpop.f32.mrf.mxu1  ;;  %v3154_v18 = vpop.f32.mrf.mxu0 }
 0x241   : > { %4942 = vst [vmem:[#allocation42_spill] sm:$0xff] %v3152_v17  ;;  %4943 = vst [vmem:[#allocation43_spill] sm:$0xff] %v3154_v18 }
 0x242   : > { %v3156_v19 = vpop.f32.mrf.mxu1  ;;  %v3158_v20 = vpop.f32.mrf.mxu0 }
 0x243   : > { %4944 = vst [vmem:[#allocation44_spill] sm:$0xff] %v3156_v19  ;;  %4945 = vst [vmem:[#allocation45_spill] sm:$0xff] %v3158_v20 }
 0x244   : > { %v3160_v21 = vpop.f32.mrf.mxu1  ;;  %v3162_v22 = vpop.f32.mrf.mxu0 }
 0x245   : > { %4946 = vst [vmem:[#allocation46_spill] sm:$0xff] %v3160_v21  ;;  %4947 = vst [vmem:[#allocation47_spill] sm:$0xff] %v3162_v22 }
 0x246   : > { %v3164_v23 = vpop.f32.mrf.mxu1  ;;  %v3166_v24 = vpop.f32.mrf.mxu0 }
 0x247   : > { %4948 = vst [vmem:[#allocation48_spill] sm:$0xff] %v3164_v23  ;;  %4949 = vst [vmem:[#allocation49_spill] sm:$0xff] %v3166_v24 }
 0x248   : > { %v3168_v25 = vpop.f32.mrf.mxu1  ;;  %v3170_v26 = vpop.f32.mrf.mxu0 }
 0x249   : > { %4950 = vst [vmem:[#allocation50_spill] sm:$0xff] %v3168_v25  ;;  %4951 = vst [vmem:[#allocation51_spill] sm:$0xff] %v3170_v26 }
 0x24a   : > { %v3172_v27 = vpop.f32.mrf.mxu1  ;;  %v3174_v28 = vpop.f32.mrf.mxu0 }
 0x24b   : > { %4952 = vst [vmem:[#allocation52_spill] sm:$0xff] %v3172_v27  ;;  %4953 = vst [vmem:[#allocation53_spill] sm:$0xff] %v3174_v28 }
 0x24c   : > { %v3176_v29 = vpop.f32.mrf.mxu1  ;;  %v3178_v30 = vpop.f32.mrf.mxu0 }
 0x24d   : > { %4954 = vst [vmem:[#allocation54_spill] sm:$0xff] %v3176_v29  ;;  %4955 = vst [vmem:[#allocation55_spill] sm:$0xff] %v3178_v30 }
 0x24e   : > { %v3180_v31 = vpop.f32.mrf.mxu1  ;;  %v3182_v32 = vpop.f32.mrf.mxu0 }
 0x24f   : > { %4956 = vst [vmem:[#allocation56_spill] sm:$0xff] %v3180_v31  ;;  %4957 = vst [vmem:[#allocation57_spill] sm:$0xff] %v3182_v32 }
 0x250   : > { %v3184_v33 = vpop.f32.mrf.mxu1  ;;  %v3186_v34 = vpop.f32.mrf.mxu0 }
 0x251   : > { %4958 = vst [vmem:[#allocation58_spill] sm:$0xff] %v3184_v33  ;;  %4959 = vst [vmem:[#allocation59_spill] sm:$0xff] %v3186_v34 }
 0x252   : > { %v3188_v35 = vpop.f32.mrf.mxu1  ;;  %v3190_v36 = vpop.f32.mrf.mxu0 }
 0x253   : > { %4960 = vst [vmem:[#allocation60_spill] sm:$0xff] %v3190_v36 }
 0x254   : > { %v3192_v37 = vpop.f32.mrf.mxu1  ;;  %v3194_v38 = vpop.f32.mrf.mxu0 }
 0x255   : > { %4961 = vst [vmem:[#allocation61_spill] sm:$0xff] %v3192_v37  ;;  %4962 = vst [vmem:[#allocation62_spill] sm:$0xff] %v3194_v38 }
 0x256   : > { %v3196_v40 = vpop.f32.mrf.mxu1  ;;  %v3198_v42 = vpop.f32.mrf.mxu0 }
 0x257   : > { %4963 = vst [vmem:[#allocation63_spill] sm:$0xff] %v3198_v42 }
 0x258   : > { %v3200_v44 = vpop.f32.mrf.mxu1  ;;  %v3202_v46 = vpop.f32.mrf.mxu0 }
 0x259   : > { %4964 = vst [vmem:[#allocation64_spill] sm:$0xff] %v3200_v44  ;;  %4965 = vst [vmem:[#allocation65_spill] sm:$0xff] %v3202_v46  ;;  %v1229_v46 = vmax.f32 %v1228_v39, %v3100_v53 }
 0x25a   : > { %v3204_v0 = vpop.f32.mrf.mxu1  ;;  %v3206_v7 = vpop.f32.mrf.mxu0 }
 0x25b   : > { %4966 = vst [vmem:[#allocation66_spill] sm:$0xff] %v3206_v7 }
 0x25c   : > { %v3208_v43 = vpop.f32.mrf.mxu1  ;;  %v3210_v45 = vpop.f32.mrf.mxu0 }
 0x25d   : > { %4967 = vst [vmem:[#allocation67_spill] sm:$0xff] %v3208_v43  ;;  %4968 = vst [vmem:[#allocation68_spill] sm:$0xff] %v3210_v45  ;;  %v1230_v43 = vmax.f32 %v1229_v46, %v3108_v57 }
 0x25e   : > { %v3214_v41 = vpop.f32.mrf.mxu1  ;;  %v3216_v38 = vpop.f32.mrf.mxu0 }
 0x25f   : > { %4969 = vst [vmem:[#allocation69_spill] sm:$0xff] %v3216_v38  ;;  %v1231_v49 = vmax.f32 %v1230_v43, %v3116_v61 }
 0x260   : > { %v3218_v42 = vpop.f32.mrf.mxu1  ;;  %v3220_v34 = vpop.f32.mrf.mxu0 }
 0x261   : > { %4970 = vst [vmem:[#allocation70_spill] sm:$0xff] %v3218_v42  ;;  %4971 = vst [vmem:[#allocation71_spill] sm:$0xff] %v3220_v34  ;;  %v1232_v34 = vmax.f32 %v1231_v49, %v3124_v2 }
 0x262   : > { %v3223_v44 = vpop.f32.mrf.mxu1  ;;  %v3225_v7 = vpop.f32.mrf.mxu0 }
 0x263   : > { %4972 = vst [vmem:[#allocation72_spill] sm:$0xff] %v3225_v7  ;;  %v1233_v53 = vmax.f32 %v1232_v34, %v3132_v6 }
 0x264   : > { %v3228_v45 = vpop.f32.mrf.mxu1  ;;  %v3230_v36 = vpop.f32.mrf.mxu0 }
 0x265   : > { %4973 = vst [vmem:[#allocation73_spill] sm:$0xff] %v3228_v45  ;;  %4974 = vst [vmem:[#allocation74_spill] sm:$0xff] %v3230_v36  ;;  %v1234_v57 = vmax.f32 %v1233_v53, %v3140_v11  ;;  %v1265_v11 = vmax.f32 %v3090_v48, %v3096_v51 }
 0x266   : > { %v3233_v47 = vpop.f32.mrf.mxu1  ;;  %v3235_v38 = vpop.f32.mrf.mxu0 }
 0x267   : > { %4975 = vst [vmem:[#allocation75_spill] sm:$0xff] %v3235_v38  ;;  %v1235_v61 = vmax.f32 %v1234_v57, %v3148_v15 }
 0x268   : > { %v3238_v42 = vpop.f32.mrf.mxu1  ;;  %v3240_v39 = vpop.f32.mrf.mxu0 }
 0x269   : > { %4976 = vst [vmem:[#allocation76_spill] sm:$0xff] %v3238_v42  ;;  %4977 = vst [vmem:[#allocation77_spill] sm:$0xff] %v3240_v39  ;;  %v1236_v2 = vmax.f32 %v1235_v61, %v3156_v19  ;;  %v1266_v61 = vmax.f32 %v1265_v11, %v3104_v55  ;;  %v1339_v55 = vmax.f32 %v3098_v52, %v3106_v56 }
 0x26a   : > { %v3243_v7 = vpop.f32.mrf.mxu1  ;;  %v3245_v46 = vpop.f32.mrf.mxu0 }
 0x26b   : > { %4978 = vst [vmem:[#allocation78_spill] sm:$0xff] %v3245_v46  ;;  %v1237_v6 = vmax.f32 %v1236_v2, %v3164_v23  ;;  %v1302_v23 = vmax.f32 %v3094_v50, %v3102_v54 }
 0x26c   : > { %v3248_v36 = vpop.f32.mrf.mxu1  ;;  %v3250_v43 = vpop.f32.mrf.mxu0 }
 0x26d   : > { %4979 = vst [vmem:[#allocation79_spill] sm:$0xff] %v3248_v36  ;;  %4980 = vst [vmem:[#allocation80_spill] sm:$0xff] %v3250_v43  ;;  %v1238_v57 = vmax.f32 %v1237_v6, %v3172_v27  ;;  %v1303_v27 = vmax.f32 %v1302_v23, %v3110_v58 }
 0x26e   : > { %v3253_v38 = vpop.f32.mrf.mxu1  ;;  %v3255_v49 = vpop.f32.mrf.mxu0 }
 0x26f   : > { %4981 = vst [vmem:[#allocation81_spill] sm:$0xff] %v3255_v49  ;;  %v1239_v19 = vmax.f32 %v1238_v57, %v3180_v31 }
 0x270   : > { %v3258_v39 = vpop.f32.mrf.mxu1  ;;  %v3260_v34 = vpop.f32.mrf.mxu0 }
 0x271   : > { %4982 = vst [vmem:[#allocation82_spill] sm:$0xff] %v3258_v39  ;;  %4983 = vst [vmem:[#allocation83_spill] sm:$0xff] %v3260_v34  ;;  %v1240_v51 = vmax.f32 %v1239_v19, %v3188_v35 }
 0x272   : > { %v3263_v46 = vpop.f32.mrf.mxu1  ;;  %v3265_v53 = vpop.f32.mrf.mxu0 }
 0x273   : > { %4984 = vst [vmem:[#allocation84_spill] sm:$0xff] %v3265_v53  ;;  %v1267_v53 = vmax.f32 %v1266_v61, %v3112_v59  ;;  %v1241_v57 = vmax.f32 %v1240_v51, %v3196_v40  ;;  %v1304_v61 = vmax.f32 %v1303_v27, %v3118_v62  ;;  %v1340_v59 = vmax.f32 %v1339_v55, %v3114_v60 }
 0x274   : > { %v3270_v15 = vpop.f32.mrf.mxu1  ;;  %v3272_v43 = vpop.f32.mrf.mxu0 }
 0x275   : > { %4985 = vst [vmem:[#allocation85_spill] sm:$0xff] %v3272_v43  ;;  %v1268_v11 = vmax.f32 %v1267_v53, %v3120_v63  ;;  %v1242_v50 = vmax.f32 %v1241_v57, %v3204_v0  ;;  %v1305_v51 = vmax.f32 %v1304_v61, %v3126_v3  ;;  %v1341_v58 = vmax.f32 %v1340_v59, %v3122_v1 }
 0x276   : > { %v3276_v34 = vpop.f32.mrf.mxu1  ;;  %v3278_v2 = vpop.f32.mrf.mxu0 }
 0x277   : > { %v1269_v19 = vmax.f32 %v1268_v11, %v3128_v4  ;;  %v1243_v52 = vmax.f32 %v1242_v50, %v3214_v41  ;;  %v1306_v11 = vmax.f32 %v1305_v51, %v3134_v8  ;;  %v1342_v60 = vmax.f32 %v1341_v58, %v3130_v5 }
 0x278   : > { %v3284_v6 = vpop.f32.mrf.mxu1  ;;  %v3286_v48 = vpop.f32.mrf.mxu0 }
 0x279   : > { %4986 = vst [vmem:[#allocation86_spill] sm:$0xff] %v3286_v48  ;;  %v1270_v56 = vmax.f32 %v1269_v19, %v3136_v9  ;;  %v1244_v57 = vmax.f32 %v1243_v52, %v3223_v44  ;;  %v1307_v50 = vmax.f32 %v1306_v11, %v3142_v12  ;;  %v1343_v1 = vmax.f32 %v1342_v60, %v3138_v10 }
 0x27a   : > { %v3293_v31 = vpop.f32.mrf.mxu1  ;;  %v3295_v54 = vpop.f32.mrf.mxu0 }
 0x27b   : > { %v1271_v55 = vmax.f32 %v1270_v56, %v3144_v13  ;;  %v1245_v19 = vmax.f32 %v1244_v57, %v3233_v47  ;;  %v1308_v52 = vmax.f32 %v1307_v50, %v3150_v16  ;;  %v1344_v5 = vmax.f32 %v1343_v1, %v3146_v14 }
 0x27c   : > { %v3301_v23 = vpop.f32.mrf.mxu1  ;;  %v3303_v53 = vpop.f32.mrf.mxu0 }
 0x27d   : > { %4987 = vst [vmem:[#allocation87_spill] sm:$0xff] %v3303_v53  ;;  %v1272_v59 = vmax.f32 %v1271_v55, %v3152_v17  ;;  %v1246_v58 = vmax.f32 %v1245_v19, %v3243_v7  ;;  %v1309_v55 = vmax.f32 %v1308_v52, %v3158_v20  ;;  %v1345_v10 = vmax.f32 %v1344_v5, %v3154_v18 }
 0x27e   : > { %v3309_v63 = vpop.f32.mrf.mxu1  ;;  %v3311_v27 = vpop.f32.mrf.mxu0 }
 0x27f   : > { %v1273_v56 = vmax.f32 %v1272_v59, %v3160_v21  ;;  %v1247_v57 = vmax.f32 %v1246_v58, %v3253_v38  ;;  %v1310_v59 = vmax.f32 %v1309_v55, %v3166_v24  ;;  %v1346_v14 = vmax.f32 %v1345_v10, %v3162_v22 }
 0x280   : > { %v3317_v62 = vpop.f32.mrf.mxu1  ;;  %v3319_v61 = vpop.f32.mrf.mxu0 }
 0x281   : > { %4988 = vst [vmem:[#allocation88_spill] sm:$0xff] %v3319_v61  ;;  %v1274_v60 = vmax.f32 %v1273_v56, %v3168_v25  ;;  %v1248_v19 = vmax.f32 %v1247_v57, %v3263_v46  ;;  %v1311_v56 = vmax.f32 %v1310_v59, %v3174_v28  ;;  %v1347_v18 = vmax.f32 %v1346_v14, %v3170_v26  ;;  %v4993_v28 = vld [vmem:[#allocation64_spill] sm:$0xff] }
 0x282   : > { %v3325_v3 = vpop.f32.mrf.mxu1  ;;  %v3327_v51 = vpop.f32.mrf.mxu0 }
 0x283   : > { %v1275_v1 = vmax.f32 %v1274_v60, %v3176_v29  ;;  %v1249_v58 = vmax.f32 %v1248_v19, %v3276_v34  ;;  %v1312_v60 = vmax.f32 %v1311_v56, %v3182_v32  ;;  %v1348_v22 = vmax.f32 %v1347_v18, %v3178_v30  ;;  %v4995_v56 = vld [vmem:[#allocation63_spill] sm:$0xff]  ;;  %v4997_v30 = vld [vmem:[#allocation62_spill] sm:$0xff] }
 0x284   : > { %v3333_v8 = vpop.f32.mrf.mxu1  ;;  %v3335_v11 = vpop.f32.mrf.mxu0  ;;  %v4996_v32 = vld [vmem:[#allocation67_spill] sm:$0xff] }
 0x285   : > { %4989 = vst [vmem:[#allocation89_spill] sm:$0xff] %v3335_v11  ;;  %v1276_v5 = vmax.f32 %v1275_v1, %v3184_v33  ;;  %v1250_v57 = vmax.f32 %v1249_v58, %v3293_v31  ;;  %v4992_v1 = vld [vmem:[#allocation60_spill] sm:$0xff]  ;;  %v4994_v33 = vld [vmem:[#allocation59_spill] sm:$0xff] }
 0x286   : > { %v3341_v12 = vpop.f32.mrf.mxu1  ;;  %v3343_v50 = vpop.f32.mrf.mxu0  ;;  %v1313_v19 = vmax.f32 %v1312_v60, %v4992_v1  ;;  %v1349_v29 = vmax.f32 %v1348_v22, %v4994_v33  ;;  %v4998_v60 = vld [vmem:[#allocation66_spill] sm:$0xff]  ;;  %v5000_v33 = vld [vmem:[#allocation65_spill] sm:$0xff] }
 0x287   : > { %v1277_v10 = vmax.f32 %v1276_v5, %v3192_v37  ;;  %v1251_v26 = vmax.f32 %v1250_v57, %v3309_v63  ;;  %v4999_v1 = vld [vmem:[#allocation70_spill] sm:$0xff] }
 0x288   : > { %v3349_v16 = vpop.f32.mrf.mxu1  ;;  %v3351_v52 = vpop.f32.mrf.mxu0  ;;  %v1314_v5 = vmax.f32 %v1313_v19, %v4995_v56  ;;  %v1350_v37 = vmax.f32 %v1349_v29, %v4997_v30  ;;  %v5001_v19 = vld [vmem:[#allocation69_spill] sm:$0xff]  ;;  %v5002_v30 = vld [vmem:[#allocation68_spill] sm:$0xff] }
 0x289   : > { %4990 = vst [vmem:[#allocation90_spill] sm:$0xff] %v3351_v52  ;;  %v1278_v14 = vmax.f32 %v1277_v10, %v4993_v28  ;;  %v1252_v18 = vmax.f32 %v1251_v26, %v3325_v3 }
 0x28a   : > { %v3357_v20 = vpop.f32.mrf.mxu1  ;;  %v3359_v55 = vpop.f32.mrf.mxu0  ;;  %v1315_v10 = vmax.f32 %v1314_v5, %v4998_v60  ;;  %v1351_v28 = vmax.f32 %v1350_v37, %v5000_v33  ;;  %v5004_v5 = vld [vmem:[#allocation72_spill] sm:$0xff]  ;;  %v5005_v33 = vld [vmem:[#allocation71_spill] sm:$0xff] }
 0x28b   : > { %v1279_v58 = vmax.f32 %v1278_v14, %v4996_v32  ;;  %v1253_v22 = vmax.f32 %v1252_v18, %v3341_v12 }
 0x28c   : > { %v3365_v24 = vpop.f32.mrf.mxu1  ;;  %v3367_v59 = vpop.f32.mrf.mxu0  ;;  %v1316_v14 = vmax.f32 %v1315_v10, %v5001_v19  ;;  %v1352_v56 = vmax.f32 %v1351_v28, %v5002_v30  ;;  %v5006_v10 = vld [vmem:[#allocation75_spill] sm:$0xff]  ;;  %v5007_v30 = vld [vmem:[#allocation74_spill] sm:$0xff] }
 0x28d   : > { %4991 = vst [vmem:[#allocation91_spill] sm:$0xff] %v3367_v59  ;;  %v1280_v57 = vmax.f32 %v1279_v58, %v4999_v1  ;;  %v1254_v29 = vmax.f32 %v1253_v22, %v3357_v20 }
 0x28e   : > { %v3373_v25 = vpop.f32.mrf.mxu1  ;;  %v3379_v21 = vpop.f32.mrf.mxu0  ;;  %v1317_v58 = vmax.f32 %v1316_v14, %v5004_v5  ;;  %v1353_v60 = vmax.f32 %v1352_v56, %v5005_v33  ;;  %v5009_v14 = vld [vmem:[#allocation78_spill] sm:$0xff]  ;;  %v5010_v33 = vld [vmem:[#allocation77_spill] sm:$0xff] }
 0x28f   : > { %v1281_v26 = vmax.f32 %v1280_v57, %v3228_v45  ;;  %v1255_v37 = vmax.f32 %v1254_v29, %v3373_v25 }
 0x290   : > { %v3381_v17 = vpop.f32.mrf.mxu1  ;;  %v3393_v32 = vpop.f32.mrf.mxu0  ;;  %v1318_v57 = vmax.f32 %v1317_v58, %v5006_v10  ;;  %v1354_v19 = vmax.f32 %v1353_v60, %v5007_v30 }
 0x291   : > { %5003 = vst [vmem:[#allocation92_spill] sm:$0xff] %v3393_v32  ;;  %v1282_v18 = vmax.f32 %v1281_v26, %v3238_v42 }
 0x292   : > { %v3387_v13 = vpop.f32.mrf.mxu1  ;;  %v3407_v45 = vpop.f32.mrf.mxu0  ;;  %v1319_v26 = vmax.f32 %v1318_v57, %v5009_v14  ;;  %v1355_v5 = vmax.f32 %v1354_v19, %v5010_v33 }
 0x293   : > { %v1283_v22 = vmax.f32 %v1282_v18, %v3248_v36  ;;  %v1256_v28 = vmax.f32 %v1255_v37, %v3387_v13  ;;  %5008 = vst [vmem:[#allocation93_spill] sm:$0xff] %v3407_v45  ;;  %v5011_v37 = vld [vmem:[#allocation80_spill] sm:$0xff] }
 0x294   : > { %v3395_v9 = vpop.f32.mrf.mxu1  ;;  %v1320_v58 = vmax.f32 %v1319_v26, %v3255_v49  ;;  %v1356_v30 = vmax.f32 %v1355_v5, %v5011_v37  ;;  %v3421_v10 = vpop.f32.mrf.mxu0  ;;  %v5013_v36 = vld [vmem:[#allocation84_spill] sm:$0xff] }
 0x295   : > { %v1284_v29 = vmax.f32 %v1283_v22, %v3258_v39  ;;  %5012 = vst [vmem:[#allocation94_spill] sm:$0xff] %v3421_v10 }
 0x296   : > { %v3401_v1 = vpop.f32.mrf.mxu1  ;;  %v1321_v57 = vmax.f32 %v1320_v58, %v5013_v36  ;;  %v3429_v49 = vpop.f32.mrf.mxu0 }
 0x297   : > { %v1257_v56 = vmax.f32 %v1256_v28, %v3401_v1  ;;  %v1285_v18 = vmax.f32 %v1284_v29, %v3270_v15  ;;  %v5014_v28 = vld [vmem:[#allocation83_spill] sm:$0xff]  ;;  %5015 = vst [vmem:[#allocation84_spill] sm:$0xff] %v3429_v49 }
 0x298   : > { %v3409_v4 = vpop.f32.mrf.mxu1  ;;  %v1357_v39 = vmax.f32 %v1356_v30, %v5014_v28  ;;  %v1322_v19 = vmax.f32 %v1321_v57, %v3278_v2 }
 0x299   : > { %v1286_v22 = vmax.f32 %v1285_v18, %v3284_v6 }
 0x29a   : > { %v3415_v42 = vpop.f32.mrf.mxu1  ;;  %v1358_v29 = vmax.f32 %v1357_v39, %v3272_v43  ;;  %v1323_v5 = vmax.f32 %v1322_v19, %v3295_v54  ;;  %v5023_v43 = vld [vmem:[#allocation24_spill] sm:$0xff] }
 0x29b   : > { %v1258_v60 = vmax.f32 %v1257_v56, %v3415_v42  ;;  %v1287_v33 = vmax.f32 %v1286_v22, %v3301_v23  ;;  %v3437_v22 = vpop.f32.mrf.mxu0 }
 0x29c   : > { %v1359_v58 = vmax.f32 %v1358_v29, %v3286_v48  ;;  %v1324_v18 = vmax.f32 %v1323_v5, %v3311_v27  ;;  %5016 = vst [vmem:[#allocation95_spill] sm:$0xff] %v3437_v22 }
 0x29d   : > { %v1259_v14 = vrot.slane %v1258_v60, 4  ;;  %v1288_v56 = vmax.f32 %v1287_v33, %v3317_v62  ;;  %v3445_v48 = vpop.f32.mrf.mxu0 }
 0x29e   : > { %v1360_v57 = vmax.f32 %v1359_v58, %v3303_v53  ;;  %v1325_v39 = vmax.f32 %v1324_v18, %v3327_v51 }
 0x29f   : > { %v1260_v26 = vmax.f32 %v1258_v60, %v1259_v14  ;;  %v1289_v30 = vmax.f32 %v1288_v56, %v3333_v8 }
 0x2a0   : > { %v1361_v19 = vmax.f32 %v1360_v57, %v3319_v61  ;;  %v1326_v33 = vmax.f32 %v1325_v39, %v3343_v50  ;;  %v3455_v39 = vpop.f32.mrf.mxu1 }
 0x2a1   : > { %v1261_v37 = vrot.slane %v1260_v26, 2  ;;  %v1290_v14 = vmax.f32 %v1289_v30, %v3349_v16 }
 0x2a2   : > { %v1362_v5 = vmax.f32 %v1361_v19, %v3335_v11  ;;  %v5021_v11 = vld [vmem:[#allocation20_spill] sm:$0xff] }
 0x2a3   : > { %v1262_v28 = vmax.f32 %v1260_v26, %v1261_v37  ;;  %v1291_v29 = vmax.f32 %v1290_v14, %v3365_v24  ;;  %v1327_v37 = vmax.f32 %v1326_v33, %v3359_v55  ;;  %v3457_v14 = vpop.f32.mrf.mxu0 }
 0x2a4   : > { %v1363_v58 = vmax.f32 %v1362_v5, %v3351_v52  ;;  %5017 = vst [vmem:[#allocation96_spill] sm:$0xff] %v3457_v14 }
 0x2a5   : > { %v1263_v60 = vrot.slane %v1262_v28, 1  ;;  %v1292_v26 = vmax.f32 %v1291_v29, %v3381_v17  ;;  %v1328_v18 = vmax.f32 %v1327_v37, %v3379_v21  ;;  %v5018_v29 = vld [vmem:[#allocation10_spill] sm:$0xff]  ;;  %v5020_v37 = vld [vmem:[#allocation16_spill] sm:$0xff]  ;;  %v3472_v61 = vpop.f32.mrf.mxu0 }
 0x2a6   : > { %v1364_v57 = vmax.f32 %v1363_v58, %v3367_v59  ;;  %5022 = vst [vmem:[#allocation10_spill] sm:$0xff] %v3472_v61 }
 0x2a7   : > { %v3449_v56 = vmax.f32 %v1262_v28, %v1263_v60  ;;  %v1293_v30 = vmax.f32 %v1292_v26, %v3395_v9  ;;  %v1329_v19 = vmax.f32 %v1328_v18, %v3407_v45  ;;  %v5019_v60 = vld [vmem:[#allocation12_spill] sm:$0xff] }
 0x2a8   : > { %v1365_v26 = vmax.f32 %v1364_v57, %v3393_v32 }
 0x2a9   : > { %v1294_v33 = vmax.f32 %v1293_v30, %v3409_v4  ;;  %v1376_v28 = vsub.f32 %v5018_v29, %v3449_v56  ;;  %v1378_v5 = vsub.f32 %v5019_v60, %v3449_v56  ;;  %v1380_v52 = vsub.f32 %v5020_v37, %v3449_v56 }
 0x2aa   : > { %v1330_v58 = vmax.f32 %v1329_v19, %v3429_v49  ;;  %v1382_v18 = vsub.f32 %v5021_v11, %v3449_v56  ;;  %v1366_v30 = vmax.f32 %v1365_v26, %v3421_v10  ;;  %v1384_v37 = vsub.f32 %v5023_v43, %v3449_v56  ;;  %v5024_v11 = vld [vmem:[#allocation28_spill] sm:$0xff]  ;;  %v3482_v26 = vpop.f32.mrf.mxu0 }
 0x2ab   : > { %v1295_v59 = vmax.f32 %v1294_v33, %v3455_v39  ;;  %v1504_v29 = vmul.f32 1.442695, %v1376_v28  ;;  %v1508_v53 = vmul.f32 1.442695, %v1378_v5  ;;  %v1512_v45 = vmul.f32 1.442695, %v1380_v52 }
 0x2ac   : > { %v1331_v60 = vmax.f32 %v1330_v58, %v3445_v48  ;;  %v1367_v57 = vmax.f32 %v1366_v30, %v3437_v22  ;;  %v1386_v32 = vsub.f32 %v5024_v11, %v3449_v56  ;;  %v1516_v49 = vmul.f32 1.442695, %v1382_v18  ;;  %5025 = vst [vmem:[#allocation12_spill] sm:$0xff] %v3482_v26  ;;  %v5026_v5 = vld [vmem:[#allocation32_spill] sm:$0xff] }
 0x2ad   : > { %2479 = vpow2.f32 %v1504_v29  ;;  %v1296_v19 = vrot.slane %v1295_v59, 4  ;;  %v1388_v58 = vsub.f32 %v5026_v5, %v3449_v56  ;;  %v1520_v43 = vmul.f32 1.442695, %v1384_v37 }
 0x2ae   : > { %v1332_v33 = vmax.f32 %v1331_v60, %v3472_v61  ;;  %2481 = vpow2.f32 %v1508_v53  ;;  %v1368_v28 = vmax.f32 %v1367_v57, %v3457_v14  ;;  %v5027_v60 = vld [vmem:[#allocation36_spill] sm:$0xff]  ;;  %v1524_v11 = vmul.f32 1.442695, %v1386_v32 }
 0x2af   : > { %2483 = vpow2.f32 %v1512_v45  ;;  %v1297_v52 = vmax.f32 %v1295_v59, %v1296_v19  ;;  %v1390_v22 = vsub.f32 %v5027_v60, %v3449_v56  ;;  %v5028_v53 = vld [vmem:[#allocation40_spill] sm:$0xff]  ;;  %v1528_v10 = vmul.f32 1.442695, %v1388_v58 }
 0x2b0   : > { %v1333_v30 = vrot.slane %v1332_v33, 4  ;;  %v1369_v29 = vmax.f32 %v1368_v28, %v3482_v26  ;;  %2485 = vpow2.f32 %v1516_v49  ;;  %v1392_v18 = vsub.f32 %v5028_v53, %v3449_v56  ;;  %v5029_v45 = vld [vmem:[#allocation44_spill] sm:$0xff] }
 0x2b1   : > { %2487 = vpow2.f32 %v1520_v43  ;;  %v1298_v57 = vrot.slane %v1297_v52, 2  ;;  %v1394_v37 = vsub.f32 %v5029_v45, %v3449_v56  ;;  %v1532_v59 = vmul.f32 1.442695, %v1390_v22  ;;  %v5030_v19 = vld [vmem:[#allocation48_spill] sm:$0xff] }
 0x2b2   : > { %v1334_v14 = vmax.f32 %v1332_v33, %v1333_v30  ;;  %v1370_v61 = vrot.slane %v1369_v29, 4  ;;  %2489 = vpow2.f32 %v1524_v11  ;;  %v1396_v28 = vsub.f32 %v5030_v19, %v3449_v56  ;;  %v5032_v58 = vld [vmem:[#allocation52_spill] sm:$0xff] }
 0x2b3   : > { %2491 = vpow2.f32 %v1528_v10  ;;  %v1536_v5 = vmul.f32 1.442695, %v1392_v18  ;;  %v1299_v49 = vmax.f32 %v1297_v52, %v1298_v57  ;;  %v1398_v33 = vsub.f32 %v5032_v58, %v3449_v56  ;;  %v5034_v22 = vld [vmem:[#allocation56_spill] sm:$0xff] }
 0x2b4   : > { %v1335_v32 = vrot.slane %v1334_v14, 2  ;;  %v3496_v60 = vmax.f32 %v1369_v29, %v1370_v61  ;;  %2493 = vpow2.f32 %v1532_v59  ;;  %v1540_v43 = vmul.f32 1.442695, %v1394_v37 }
 0x2b5   : > { %v1400_v11 = vsub.f32 %v5034_v22, %v3449_v56  ;;  %2495 = vpow2.f32 %v1536_v5  ;;  %v1544_v45 = vmul.f32 1.442695, %v1396_v28  ;;  %v1300_v61 = vrot.slane %v1299_v49, 1 }
 0x2b6   : > { %v3510_v29 = vmax.f32 %v1334_v14, %v1335_v32  ;;  %v1372_v18 = vrot.slane %v3496_v60, 2  ;;  %v1402_v57 = vsub.f32 %v3188_v35, %v3449_v56  ;;  %2497 = vpow2.f32 %v1540_v43 }
 0x2b7   : > { %v1548_v37 = vmul.f32 1.442695, %v1398_v33  ;;  %v1404_v28 = vsub.f32 %v3196_v40, %v3449_v56  ;;  %v1406_v5 = vsub.f32 %v3204_v0, %v3449_v56  ;;  %v1408_v14 = vsub.f32 %v3214_v41, %v3449_v56 }
 0x2b8   : > { %v1410_v32 = vsub.f32 %v3223_v44, %v3449_v56  ;;  %v1412_v35 = vsub.f32 %v3233_v47, %v3449_v56  ;;  %2499 = vpow2.f32 %v1544_v45  ;;  %v1552_v58 = vmul.f32 1.442695, %v1400_v11 }
 0x2b9   : > { %v1414_v40 = vsub.f32 %v3243_v7, %v3449_v56  ;;  %v1416_v0 = vsub.f32 %v3253_v38, %v3449_v56  ;;  %v1418_v41 = vsub.f32 %v3263_v46, %v3449_v56  ;;  %v3537_v22 = vmax.f32 %v1299_v49, %v1300_v61 }
 0x2ba   : > { %v3498_v53 = vpop.eup %2479  ;;  %v1420_v47 = vsub.f32 %v3276_v34, %v3449_v56  ;;  %2501 = vpow2.f32 %v1548_v37  ;;  %v1556_v44 = vmul.f32 1.442695, %v1402_v57  ;;  %v1422_v7 = vsub.f32 %v3293_v31, %v3449_v56 }
 0x2bb   : > { %5031 = vst [vmem:[#allocation16_spill] sm:$0xff] %v3498_v53  ;;  %v3502_v30 = vpop.eup %2481  ;;  %v1424_v38 = vsub.f32 %v3309_v63, %v3449_v56  ;;  %v1426_v46 = vsub.f32 %v3325_v3, %v3449_v56  ;;  %v1560_v49 = vmul.f32 1.442695, %v1404_v28  ;;  %2503 = vpow2.f32 %v1552_v58 }
 0x2bc   : > { %5033 = vst [vmem:[#allocation20_spill] sm:$0xff] %v3502_v30  ;;  %v1760_v10 = vadd.f32 %v3502_v30, %v3498_v53  ;;  %v3508_v52 = vpop.eup %2483  ;;  %v1564_v34 = vmul.f32 1.442695, %v1406_v5  ;;  %v1430_v37 = vsub.f32 %v3357_v20, %v3449_v56  ;;  %v1432_v31 = vsub.f32 %v3373_v25, %v3449_v56  ;;  %v5041_v5 = vld [vmem:[#allocation14_spill] sm:$0xff] }
 0x2bd   : > { %5035 = vst [vmem:[#allocation24_spill] sm:$0xff] %v3508_v52  ;;  %v3516_v19 = vpop.eup %2485  ;;  %v1568_v63 = vmul.f32 1.442695, %v1408_v14  ;;  %2505 = vpow2.f32 %v1556_v44  ;;  %v1572_v28 = vmul.f32 1.442695, %v1410_v32  ;;  %v1379_v58 = vsub.f32 %v5041_v5, %v3537_v22  ;;  %v5043_v32 = vld [vmem:[#allocation18_spill] sm:$0xff] }
 0x2be   : > { %v1761_v59 = vadd.f32 %v3508_v52, %v1760_v10  ;;  %5036 = vst [vmem:[#allocation28_spill] sm:$0xff] %v3516_v19  ;;  %v3529_v43 = vpop.eup %2487  ;;  %v1428_v10 = vsub.f32 %v3341_v12, %v3449_v56  ;;  %v1436_v20 = vsub.f32 %v3401_v1, %v3449_v56  ;;  %2507 = vpow2.f32 %v1560_v49 }
 0x2bf   : > { %5037 = vst [vmem:[#allocation32_spill] sm:$0xff] %v3529_v43  ;;  %v3542_v45 = vpop.eup %2489  ;;  %v1576_v25 = vmul.f32 1.442695, %v1412_v35  ;;  %2509 = vpow2.f32 %v1564_v34  ;;  %v1580_v14 = vmul.f32 1.442695, %v1414_v40  ;;  %v1438_v5 = vsub.f32 %v3415_v42, %v3449_v56  ;;  %v5045_v35 = vld [vmem:[#allocation22_spill] sm:$0xff] }
 0x2c0   : > { %v1762_v33 = vadd.f32 %v3516_v19, %v1761_v59  ;;  %5038 = vst [vmem:[#allocation36_spill] sm:$0xff] %v3542_v45  ;;  %v3553_v57 = vpop.eup %2491  ;;  %v5040_v59 = vld [vmem:[#allocation11_spill] sm:$0xff]  ;;  %2511 = vpow2.f32 %v1568_v63  ;;  %v1383_v40 = vsub.f32 %v5045_v35, %v3537_v22  ;;  %v1510_v49 = vmul.f32 1.442695, %v1379_v58 }
 0x2c1   : > { %5039 = vst [vmem:[#allocation40_spill] sm:$0xff] %v3553_v57  ;;  %v1377_v3 = vsub.f32 %v5040_v59, %v3537_v22  ;;  %2513 = vpow2.f32 %v1572_v28  ;;  %v1592_v30 = vmul.f32 1.442695, %v1420_v47  ;;  %v1600_v28 = vmul.f32 1.442695, %v1424_v38  ;;  %v5051_v38 = vld [vmem:[#allocation34_spill] sm:$0xff] }
 0x2c2   : > { %v1763_v11 = vadd.f32 %v3529_v43, %v1762_v33  ;;  %v3564_v33 = vpop.eup %2493  ;;  %2515 = vpow2.f32 %v1576_v25  ;;  %v5049_v25 = vld [vmem:[#allocation30_spill] sm:$0xff] }
 0x2c3   : > { %5042 = vst [vmem:[#allocation44_spill] sm:$0xff] %v3564_v33  ;;  %v3573_v59 = vpop.eup %2495  ;;  %v1506_v53 = vmul.f32 1.442695, %v1377_v3  ;;  %2517 = vpow2.f32 %v1580_v14  ;;  %v1596_v3 = vmul.f32 1.442695, %v1422_v7 }
 0x2c4   : > { %v1764_v61 = vadd.f32 %v3542_v45, %v1763_v11  ;;  %v1434_v11 = vsub.f32 %v3387_v13, %v3449_v56  ;;  %5044 = vst [vmem:[#allocation48_spill] sm:$0xff] %v3573_v59  ;;  %v3578_v13 = vmax.f32 %v3496_v60, %v1372_v18  ;;  %v3583_v34 = vpop.eup %2497  ;;  %v5047_v56 = vld [vmem:[#allocation26_spill] sm:$0xff]  ;;  %v1608_v14 = vmul.f32 1.442695, %v1428_v10 }
 0x2c5   : > { %5046 = vst [vmem:[#allocation52_spill] sm:$0xff] %v3583_v34  ;;  %v1385_v60 = vsub.f32 %v5047_v56, %v3537_v22  ;;  %v3588_v63 = vpop.eup %2499  ;;  %2519 = vpow2.f32 %v1506_v53  ;;  %v1389_v53 = vsub.f32 %v5051_v38, %v3537_v22 }
 0x2c6   : > { %v1765_v12 = vadd.f32 %v3553_v57, %v1764_v61  ;;  %v1381_v61 = vsub.f32 %v5043_v32, %v3537_v22  ;;  %v1588_v32 = vmul.f32 1.442695, %v1418_v41  ;;  %5048 = vst [vmem:[#allocation56_spill] sm:$0xff] %v3588_v63  ;;  %2521 = vpow2.f32 %v1510_v49 }
 0x2c7   : > { %v1518_v41 = vmul.f32 1.442695, %v1383_v40  ;;  %v3593_v47 = vpop.eup %2501  ;;  %v3604_v49 = vmul.f32 1.442695, %v1434_v11  ;;  %v3606_v40 = vmul.f32 1.442695, %v1436_v20 }
 0x2c8   : > { %v1766_v44 = vadd.f32 %v3564_v33, %v1765_v12  ;;  %v1584_v12 = vmul.f32 1.442695, %v1416_v0  ;;  %v1514_v18 = vmul.f32 1.442695, %v1381_v61  ;;  %v1387_v0 = vsub.f32 %v5049_v25, %v3537_v22  ;;  %5050 = vst [vmem:[#allocation11_spill] sm:$0xff] %v3593_v47  ;;  %v3602_v35 = vpop.eup %2503  ;;  %v5055_v11 = vld [vmem:[#allocation46_spill] sm:$0xff] }
 0x2c9   : > { %v3597_v61 = vmul.f32 1.442695, %v1432_v31  ;;  %5052 = vst [vmem:[#allocation14_spill] sm:$0xff] %v3602_v35  ;;  %v5056_v20 = vld [vmem:[#allocation50_spill] sm:$0xff] }
 0x2ca   : > { %v1767_v1 = vadd.f32 %v3573_v59, %v1766_v44  ;;  %v1604_v44 = vmul.f32 1.442695, %v1426_v46  ;;  %2523 = vpow2.f32 %v1584_v12  ;;  %v1522_v46 = vmul.f32 1.442695, %v1385_v60  ;;  %v3613_v56 = vpop.eup %2505  ;;  %v5054_v60 = vld [vmem:[#allocation42_spill] sm:$0xff] }
 0x2cb   : > { %2525 = vpow2.f32 %v1514_v18  ;;  %v3608_v12 = vmul.f32 1.442695, %v1438_v5  ;;  %v1393_v18 = vsub.f32 %v5054_v60, %v3537_v22  ;;  %v1397_v5 = vsub.f32 %v5056_v20, %v3537_v22  ;;  %v5059_v60 = vld [vmem:[#allocation61_spill] sm:$0xff]  ;;  %v5060_v20 = vld [vmem:[#allocation64_spill] sm:$0xff] }
 0x2cc   : > { %v1768_v42 = vadd.f32 %v3583_v34, %v1767_v1  ;;  %v3595_v1 = vmul.f32 1.442695, %v1430_v37  ;;  %2527 = vpow2.f32 %v1588_v32  ;;  %v5053_v37 = vld [vmem:[#allocation38_spill] sm:$0xff]  ;;  %v1395_v32 = vsub.f32 %v5055_v11, %v3537_v22 }
 0x2cd   : > { %v1391_v31 = vsub.f32 %v5053_v37, %v3537_v22  ;;  %2529 = vpow2.f32 %v1518_v41  ;;  %v1403_v11 = vsub.f32 %v5059_v60, %v3537_v22  ;;  %v1405_v52 = vsub.f32 %v5060_v20, %v3537_v22  ;;  %v5065_v60 = vld [vmem:[#allocation73_spill] sm:$0xff]  ;;  %v5066_v20 = vld [vmem:[#allocation76_spill] sm:$0xff] }
 0x2ce   : > { %v1769_v58 = vadd.f32 %v3588_v63, %v1768_v42  ;;  %v1526_v42 = vmul.f32 1.442695, %v1387_v0  ;;  %2531 = vpow2.f32 %v1592_v30  ;;  %v1530_v0 = vmul.f32 1.442695, %v1389_v53  ;;  %v5058_v30 = vld [vmem:[#allocation58_spill] sm:$0xff]  ;;  %v5117_v63 = vld [vmem:[#allocation81_spill] sm:$0xff] }
 0x2cf   : > { %2533 = vpow2.f32 %v1522_v46  ;;  %v1401_v37 = vsub.f32 %v5058_v30, %v3537_v22  ;;  %v1534_v53 = vmul.f32 1.442695, %v1391_v31  ;;  %v1411_v45 = vsub.f32 %v5065_v60, %v3537_v22 }
 0x2d0   : > { %v1770_v7 = vadd.f32 %v3593_v47, %v1769_v58  ;;  %v3621_v58 = vpop.eup %2507  ;;  %2535 = vpow2.f32 %v1596_v3  ;;  %v5064_v3 = vld [vmem:[#allocation70_spill] sm:$0xff]  ;;  %v1413_v57 = vsub.f32 %v5066_v20, %v3537_v22  ;;  %v1538_v31 = vmul.f32 1.442695, %v1393_v18 }
 0x2d1   : > { %v3626_v38 = vpop.eup %2509  ;;  %2537 = vpow2.f32 %v1526_v42  ;;  %v1409_v30 = vsub.f32 %v5064_v3, %v3537_v22  ;;  %v1419_v60 = vsub.f32 %v3270_v15, %v3537_v22  ;;  %v1542_v18 = vmul.f32 1.442695, %v1395_v32 }
 0x2d2   : > { %v1771_v10 = vadd.f32 %v3602_v35, %v1770_v7  ;;  %v5057_v7 = vld [vmem:[#allocation54_spill] sm:$0xff]  ;;  %v3634_v19 = vpop.eup %2511  ;;  %2539 = vpow2.f32 %v1600_v28 }
 0x2d3   : > { %v1399_v41 = vsub.f32 %v5057_v7, %v3537_v22  ;;  %5061 = vst [vmem:[#allocation18_spill] sm:$0xff] %v3634_v19  ;;  %v5062_v7 = vld [vmem:[#allocation67_spill] sm:$0xff]  ;;  %v3639_v43 = vpop.eup %2513  ;;  %2541 = vpow2.f32 %v1530_v0  ;;  %v5070_v28 = vld [vmem:[#allocation82_spill] sm:$0xff]  ;;  %v1546_v0 = vmul.f32 1.442695, %v1397_v5 }
 0x2d4   : > { %v1772_v25 = vadd.f32 %v3613_v56, %v1771_v10  ;;  %v1407_v46 = vsub.f32 %v5062_v7, %v3537_v22  ;;  %5063 = vst [vmem:[#allocation22_spill] sm:$0xff] %v3639_v43  ;;  %v3647_v33 = vpop.eup %2515  ;;  %v5068_v7 = vld [vmem:[#allocation79_spill] sm:$0xff]  ;;  %2543 = vpow2.f32 %v1604_v44  ;;  %v1417_v3 = vsub.f32 %v5070_v28, %v3537_v22 }
 0x2d5   : > { %5067 = vst [vmem:[#allocation26_spill] sm:$0xff] %v3647_v33  ;;  %v1415_v42 = vsub.f32 %v5068_v7, %v3537_v22  ;;  %v3652_v59 = vpop.eup %2517  ;;  %2545 = vpow2.f32 %v1534_v53  ;;  %v1425_v44 = vsub.f32 %v3317_v62, %v3537_v22  ;;  %v1337_v28 = vrot.slane %v3510_v29, 1 }
 0x2d6   : > { %v1773_v10 = vadd.f32 %v3621_v58, %v1772_v25  ;;  %5069 = vst [vmem:[#allocation30_spill] sm:$0xff] %v3652_v59  ;;  %v3660_v34 = vpop.eup %2519  ;;  %2547 = vpow2.f32 %v1608_v14  ;;  %v1550_v5 = vmul.f32 1.442695, %v1399_v41  ;;  %v1554_v41 = vmul.f32 1.442695, %v1401_v37 }
 0x2d7   : > { %5071 = vst [vmem:[#allocation34_spill] sm:$0xff] %v3660_v34  ;;  %v3665_v7 = vpop.eup %2521  ;;  %2549 = vpow2.f32 %v1538_v31 }
 0x2d8   : > { %v1774_v25 = vadd.f32 %v3626_v38, %v1773_v10  ;;  %5072 = vst [vmem:[#allocation38_spill] sm:$0xff] %v3665_v7  ;;  %v3673_v20 = vpop.eup %2523  ;;  %v1797_v32 = vadd.f32 %v3665_v7, %v3660_v34  ;;  %2551 = vpow2.f32 %v3595_v1  ;;  %v1562_v1 = vmul.f32 1.442695, %v1405_v52 }
 0x2d9   : > { %5073 = vst [vmem:[#allocation42_spill] sm:$0xff] %v3673_v20  ;;  %v3678_v53 = vpop.eup %2525  ;;  %2553 = vpow2.f32 %v1542_v18  ;;  %v1566_v34 = vmul.f32 1.442695, %v1407_v46  ;;  %v1586_v46 = vmul.f32 1.442695, %v1417_v3 }
 0x2da   : > { %v1775_v10 = vadd.f32 %v3634_v19, %v1774_v25  ;;  %5074 = vst [vmem:[#allocation46_spill] sm:$0xff] %v3678_v53  ;;  %v3686_v15 = vpop.eup %2527  ;;  %2555 = vpow2.f32 %v3597_v61  ;;  %v1558_v61 = vmul.f32 1.442695, %v1403_v11 }
 0x2db   : > { %v3690_v19 = vpop.eup %2529  ;;  %2557 = vpow2.f32 %v1546_v0 }
 0x2dc   : > { %v1776_v25 = vadd.f32 %v3639_v43, %v1775_v10  ;;  %v1798_v10 = vadd.f32 %v3678_v53, %v1797_v32  ;;  %5075 = vst [vmem:[#allocation50_spill] sm:$0xff] %v3690_v19  ;;  %v3699_v43 = vpop.eup %2531  ;;  %2559 = vpow2.f32 %v3604_v49  ;;  %v1578_v49 = vmul.f32 1.442695, %v1413_v57 }
 0x2dd   : > { %v3703_v32 = vpop.eup %2533  ;;  %2561 = vpow2.f32 %v1550_v5  ;;  %v1590_v5 = vmul.f32 1.442695, %v1419_v60  ;;  %v5083_v60 = vsub.f32 %v3301_v23, %v3537_v22 }
 0x2de   : > { %v1777_v31 = vadd.f32 %v3647_v33, %v1776_v25  ;;  %v1799_v25 = vadd.f32 %v3690_v19, %v1798_v10  ;;  %5076 = vst [vmem:[#allocation54_spill] sm:$0xff] %v3703_v32  ;;  %v3707_v33 = vmax.f32 %v3510_v29, %v1337_v28  ;;  %v3709_v14 = vpop.eup %2535  ;;  %2563 = vpow2.f32 %v3606_v40  ;;  %v5098_v19 = vld [vmem:[#allocation37_spill] sm:$0xff] }
 0x2df   : > { %v3713_v37 = vpop.eup %2537  ;;  %v1574_v10 = vmul.f32 1.442695, %v1411_v45  ;;  %2565 = vpow2.f32 %v1554_v41  ;;  %v1582_v29 = vmul.f32 1.442695, %v1415_v42  ;;  %v5080_v42 = vld [vmem:[#allocation17_spill] sm:$0xff] }
 0x2e0   : > { %v1778_v18 = vadd.f32 %v3652_v59, %v1777_v31  ;;  %v1800_v0 = vadd.f32 %v3703_v32, %v1799_v25  ;;  %5077 = vst [vmem:[#allocation58_spill] sm:$0xff] %v3713_v37  ;;  %v1570_v31 = vmul.f32 1.442695, %v1409_v30  ;;  %v3716_v11 = vpop.eup %2539  ;;  %2567 = vpow2.f32 %v3608_v12  ;;  %v5079_v25 = vld [vmem:[#allocation13_spill] sm:$0xff] }
 0x2e1   : > { %v1440_v40 = vsub.f32 %v5079_v25, %v3707_v33  ;;  %2569 = vpow2.f32 %v1558_v61  ;;  %v5082_v12 = vsub.f32 %v3284_v6, %v3537_v22  ;;  %v3741_v25 = vmul.f32 1.442695, %v1425_v44  ;;  %v5087_v44 = vld [vmem:[#allocation25_spill] sm:$0xff] }
 0x2e2   : > { %v1779_v62 = vadd.f32 %v3673_v20, %v1778_v18  ;;  %v1801_v28 = vadd.f32 %v3713_v37, %v1800_v0  ;;  %v3720_v18 = vpop.eup %2541  ;;  %2571 = vpow2.f32 %v1562_v1  ;;  %v3739_v0 = vmul.f32 1.442695, %v5083_v60  ;;  %v5084_v1 = vld [vmem:[#allocation21_spill] sm:$0xff] }
 0x2e3   : > { %5078 = vst [vmem:[#allocation61_spill] sm:$0xff] %v3720_v18  ;;  %v3725_v30 = vpop.eup %2543  ;;  %v1594_v3 = vmul.f32 1.442695, %v5082_v12  ;;  %2573 = vpow2.f32 %v1566_v34  ;;  %v5086_v6 = vsub.f32 %v3333_v8, %v3537_v22  ;;  %v1446_v12 = vsub.f32 %v5087_v44, %v3707_v33  ;;  %v5091_v44 = vld [vmem:[#allocation29_spill] sm:$0xff] }
 0x2e4   : > { %v1780_v52 = vadd.f32 %v3686_v15, %v1779_v62  ;;  %v1802_v57 = vadd.f32 %v3720_v18, %v1801_v28  ;;  %v1442_v62 = vsub.f32 %v5080_v42, %v3707_v33  ;;  %v3731_v41 = vpop.eup %2545  ;;  %v1444_v42 = vsub.f32 %v5084_v1, %v3707_v33 }
 0x2e5   : > { %5081 = vst [vmem:[#allocation64_spill] sm:$0xff] %v3731_v41  ;;  %v3743_v61 = vpop.eup %2547  ;;  %2575 = vpow2.f32 %v1570_v31  ;;  %v3754_v23 = vmul.f32 1.442695, %v5086_v6  ;;  %v1632_v60 = vmul.f32 1.442695, %v1440_v40  ;;  %v5089_v8 = vsub.f32 %v3349_v16, %v3537_v22 }
 0x2e6   : > { %v1781_v45 = vadd.f32 %v3699_v43, %v1780_v52  ;;  %v1803_v28 = vadd.f32 %v3731_v41, %v1802_v57  ;;  %v3749_v59 = vpop.eup %2549  ;;  %2577 = vpow2.f32 %v1574_v10  ;;  %v1636_v57 = vmul.f32 1.442695, %v1442_v62 }
 0x2e7   : > { %5085 = vst [vmem:[#allocation67_spill] sm:$0xff] %v3749_v59  ;;  %v3758_v20 = vpop.eup %2551  ;;  %2579 = vpow2.f32 %v1578_v49  ;;  %v3767_v31 = vmul.f32 1.442695, %v5089_v8  ;;  %v5090_v6 = vsub.f32 %v3365_v24, %v3537_v22  ;;  %v5093_v16 = vsub.f32 %v3381_v17, %v3537_v22  ;;  %v5094_v24 = vld [vmem:[#allocation33_spill] sm:$0xff] }
 0x2e8   : > { %v1782_v52 = vadd.f32 %v3709_v14, %v1781_v45  ;;  %v1804_v45 = vadd.f32 %v3749_v59, %v1803_v28  ;;  %v3762_v1 = vpop.eup %2553  ;;  %2581 = vpow2.f32 %v1582_v29  ;;  %v1640_v28 = vmul.f32 1.442695, %v1444_v42 }
 0x2e9   : > { %5088 = vst [vmem:[#allocation70_spill] sm:$0xff] %v3762_v1  ;;  %v3772_v40 = vmul.f32 1.442695, %v5090_v6  ;;  %v3776_v10 = vpop.eup %2555  ;;  %v3785_v8 = vmul.f32 1.442695, %v5093_v16  ;;  %v1450_v6 = vsub.f32 %v5094_v24, %v3707_v33  ;;  %2583 = vpow2.f32 %v1632_v60 }
 0x2ea   : > { %v1783_v34 = vadd.f32 %v3716_v11, %v1782_v52  ;;  %v1448_v52 = vsub.f32 %v5091_v44, %v3707_v33  ;;  %v1805_v49 = vadd.f32 %v3762_v1, %v1804_v45  ;;  %v3780_v7 = vpop.eup %2557  ;;  %v1374_v44 = vrot.slane %v3578_v13, 1  ;;  %v5116_v1 = vld [vmem:[#allocation78_spill] sm:$0xff] }
 0x2eb   : > { %5092 = vst [vmem:[#allocation73_spill] sm:$0xff] %v3780_v7  ;;  %v3790_v53 = vpop.eup %2559  ;;  %2585 = vpow2.f32 %v1636_v57  ;;  %v1644_v42 = vmul.f32 1.442695, %v1446_v12  ;;  %v5096_v17 = vsub.f32 %v3395_v9, %v3537_v22  ;;  %v5097_v60 = vsub.f32 %v3409_v4, %v3537_v22 }
 0x2ec   : > { %v1784_v62 = vadd.f32 %v3725_v30, %v1783_v34  ;;  %v1806_v34 = vadd.f32 %v3780_v7, %v1805_v49  ;;  %v3794_v45 = vpop.eup %2561  ;;  %2587 = vpow2.f32 %v1586_v46  ;;  %v1648_v46 = vmul.f32 1.442695, %v1448_v52 }
 0x2ed   : > { %5095 = vst [vmem:[#allocation76_spill] sm:$0xff] %v3794_v45  ;;  %v3799_v16 = vmul.f32 1.442695, %v5096_v17  ;;  %v3804_v24 = vmul.f32 1.442695, %v5097_v60  ;;  %v3808_v32 = vpop.eup %2563  ;;  %2589 = vpow2.f32 %v1640_v28  ;;  %v5100_v9 = vsub.f32 %v3455_v39, %v3537_v22  ;;  %v5101_v17 = vld [vmem:[#allocation41_spill] sm:$0xff] }
 0x2ee   : > { %v1785_v29 = vadd.f32 %v3743_v61, %v1784_v62  ;;  %v1452_v62 = vsub.f32 %v5098_v19, %v3707_v33  ;;  %v1807_v57 = vadd.f32 %v3794_v45, %v1806_v34  ;;  %v3812_v49 = vpop.eup %2565  ;;  %2591 = vpow2.f32 %v1590_v5  ;;  %v5102_v39 = vld [vmem:[#allocation45_spill] sm:$0xff] }
 0x2ef   : > { %5099 = vst [vmem:[#allocation79_spill] sm:$0xff] %v3812_v49  ;;  %v3817_v4 = vmul.f32 1.442695, %v5100_v9  ;;  %v1454_v60 = vsub.f32 %v5101_v17, %v3707_v33  ;;  %v3822_v19 = vmax.f32 %v3578_v13, %v1374_v44  ;;  %v3824_v37 = vpop.eup %2567  ;;  %2593 = vpow2.f32 %v1644_v42  ;;  %v5103_v34 = vld [vmem:[#allocation49_spill] sm:$0xff] }
 0x2f0   : > { %v1786_v12 = vadd.f32 %v3758_v20, %v1785_v29  ;;  %v1808_v52 = vadd.f32 %v3812_v49, %v1807_v57  ;;  %v1652_v28 = vmul.f32 1.442695, %v1450_v6  ;;  %v3828_v5 = vpop.eup %2569  ;;  %2595 = vpow2.f32 %v1594_v3  ;;  %v5104_v13 = vld [vmem:[#allocation53_spill] sm:$0xff] }
 0x2f1   : > { %v1456_v22 = vsub.f32 %v5102_v39, %v3707_v33  ;;  %v1458_v9 = vsub.f32 %v5103_v34, %v3707_v33  ;;  %v1460_v44 = vsub.f32 %v5104_v13, %v3707_v33  ;;  %v3836_v17 = vpop.eup %2571  ;;  %2597 = vpow2.f32 %v1648_v46  ;;  %v5105_v3 = vld [vmem:[#allocation57_spill] sm:$0xff]  ;;  %v5106_v34 = vld [vmem:[#allocation60_spill] sm:$0xff]  ;;  %v5107_v13 = vld [vmem:[#allocation63_spill] sm:$0xff] }
 0x2f2   : > { %v1787_v29 = vadd.f32 %v3776_v10, %v1786_v12  ;;  %v1809_v57 = vadd.f32 %v3828_v5, %v1808_v52  ;;  %v1656_v6 = vmul.f32 1.442695, %v1452_v62  ;;  %v3840_v42 = vpop.eup %2573  ;;  %2599 = vpow2.f32 %v3739_v0  ;;  %v5110_v0 = vld [vmem:[#allocation66_spill] sm:$0xff] }
 0x2f3   : > { %v1462_v39 = vsub.f32 %v5105_v3, %v3707_v33  ;;  %v1464_v18 = vsub.f32 %v5106_v34, %v3707_v33  ;;  %v1466_v41 = vsub.f32 %v5107_v13, %v3707_v33  ;;  %v3849_v59 = vpop.eup %2575  ;;  %2601 = vpow2.f32 %v1652_v28  ;;  %v5111_v34 = vld [vmem:[#allocation69_spill] sm:$0xff]  ;;  %v5112_v13 = vld [vmem:[#allocation72_spill] sm:$0xff] }
 0x2f4   : > { %v1788_v12 = vadd.f32 %v3790_v53, %v1787_v29  ;;  %5108 = vst [vmem:[#allocation82_spill] sm:$0xff] %v3849_v59  ;;  %v1810_v46 = vadd.f32 %v3836_v17, %v1809_v57  ;;  %v1660_v62 = vmul.f32 1.442695, %v1454_v60  ;;  %v3853_v52 = vpop.eup %2577  ;;  %2603 = vpow2.f32 %v3741_v25  ;;  %v5115_v25 = vld [vmem:[#allocation75_spill] sm:$0xff] }
 0x2f5   : > { %5109 = vst [vmem:[#allocation13_spill] sm:$0xff] %v3853_v52  ;;  %v1468_v3 = vsub.f32 %v5110_v0, %v3707_v33  ;;  %v3862_v7 = vpop.eup %2579  ;;  %2605 = vpow2.f32 %v1656_v6  ;;  %v1664_v60 = vmul.f32 1.442695, %v1456_v22  ;;  %v1668_v22 = vmul.f32 1.442695, %v1458_v9 }
 0x2f6   : > { %v1789_v29 = vadd.f32 %v3808_v32, %v1788_v12  ;;  %5113 = vst [vmem:[#allocation17_spill] sm:$0xff] %v3862_v7  ;;  %v1811_v28 = vadd.f32 %v3840_v42, %v1810_v46  ;;  %v3866_v57 = vpop.eup %2581  ;;  %2607 = vpow2.f32 %v3754_v23  ;;  %v1672_v0 = vmul.f32 1.442695, %v1460_v44 }
 0x2f7   : > { %5114 = vst [vmem:[#allocation21_spill] sm:$0xff] %v3866_v57  ;;  %v3875_v45 = vpop.eup %2583  ;;  %2609 = vpow2.f32 %v1660_v62  ;;  %v1676_v44 = vmul.f32 1.442695, %v1462_v39 }
 0x2f8   : > { %v1790_v12 = vadd.f32 %v3824_v37, %v1789_v29  ;;  %5118 = vst [vmem:[#allocation25_spill] sm:$0xff] %v3875_v45  ;;  %v1812_v46 = vadd.f32 %v3849_v59, %v1811_v28  ;;  %v3878_v6 = vpop.eup %2585  ;;  %2611 = vpow2.f32 %v3767_v31  ;;  %v1680_v28 = vmul.f32 1.442695, %v1464_v18 }
 0x2f9   : > { %5119 = vst [vmem:[#allocation29_spill] sm:$0xff] %v3878_v6  ;;  %v3885_v35 = vpop.eup %2587  ;;  %2613 = vpow2.f32 %v1664_v60  ;;  %v1834_v9 = vadd.f32 %v3878_v6, %v3875_v45  ;;  %v1684_v31 = vmul.f32 1.442695, %v1466_v41 }
 0x2fa   : > { %v1791_v29 = vrot.slane %v1790_v12, 4  ;;  %5120 = vst [vmem:[#allocation33_spill] sm:$0xff] %v3885_v35  ;;  %v1813_v49 = vadd.f32 %v3853_v52, %v1812_v46  ;;  %v3890_v62 = vpop.eup %2589  ;;  %2615 = vpow2.f32 %v3772_v40 }
 0x2fb   : > { %5121 = vst [vmem:[#allocation37_spill] sm:$0xff] %v3890_v62  ;;  %v3897_v47 = vpop.eup %2591  ;;  %2617 = vpow2.f32 %v1668_v22  ;;  %v1835_v60 = vadd.f32 %v3890_v62, %v1834_v9  ;;  %v1688_v9 = vmul.f32 1.442695, %v1468_v3  ;;  %v5129_v3 = vsub.f32 %v5112_v13, %v3707_v33 }
 0x2fc   : > { %v1792_v26 = vadd.f32 %v1791_v29, %v1790_v12  ;;  %v1814_v29 = vadd.f32 %v3862_v7, %v1813_v49  ;;  %v3901_v46 = vpop.eup %2593  ;;  %2619 = vpow2.f32 %v3785_v8  ;;  %v5133_v13 = vsub.f32 %v5115_v25, %v3707_v33 }
 0x2fd   : > { %5122 = vst [vmem:[#allocation41_spill] sm:$0xff] %v3901_v46  ;;  %v3908_v39 = vpop.eup %2595  ;;  %2621 = vpow2.f32 %v1672_v0  ;;  %v1836_v49 = vadd.f32 %v3901_v46, %v1835_v60  ;;  %v5126_v60 = vld [vmem:[#allocation84_spill] sm:$0xff]  ;;  %v1696_v8 = vmul.f32 1.442695, %v5129_v3  ;;  %v5137_v25 = vsub.f32 %v5117_v63, %v3707_v33 }
 0x2fe   : > { %v1793_v12 = vrot.slane %v1792_v26, 2  ;;  %v1815_v45 = vadd.f32 %v3866_v57, %v1814_v29  ;;  %v3912_v22 = vpop.eup %2597  ;;  %2623 = vpow2.f32 %v3799_v16  ;;  %v5125_v16 = vld [vmem:[#allocation93_spill] sm:$0xff]  ;;  %v5141_v63 = vsub.f32 %v3278_v2, %v3707_v33 }
 0x2ff   : > { %5123 = vst [vmem:[#allocation45_spill] sm:$0xff] %v3912_v22  ;;  %v3919_v18 = vpop.eup %2599  ;;  %2625 = vpow2.f32 %v1676_v44  ;;  %v1837_v0 = vadd.f32 %v3912_v22, %v1836_v49  ;;  %v5128_v49 = vsub.f32 %v5111_v34, %v3707_v33  ;;  %v5132_v34 = vld [vmem:[#allocation10_spill] sm:$0xff]  ;;  %v5145_v2 = vsub.f32 %v3311_v27, %v3707_v33 }
 0x300   : > { %v1794_v23 = vadd.f32 %v1793_v12, %v1792_v26  ;;  %v1816_v26 = vadd.f32 %v3885_v35, %v1815_v45  ;;  %v3923_v12 = vpop.eup %2601  ;;  %2627 = vpow2.f32 %v3804_v24  ;;  %v5149_v27 = vsub.f32 %v3343_v50, %v3707_v33 }
 0x301   : > { %5124 = vst [vmem:[#allocation49_spill] sm:$0xff] %v3923_v12  ;;  %v3930_v41 = vpop.eup %2603  ;;  %2629 = vpow2.f32 %v1680_v28  ;;  %v1838_v45 = vadd.f32 %v3923_v12, %v1837_v0  ;;  %v1692_v29 = vmul.f32 1.442695, %v5128_v49  ;;  %v1700_v49 = vmul.f32 1.442695, %v5133_v13 }
 0x302   : > { %v1795_v40 = vrot.slane %v1794_v23, 1  ;;  %v1817_v6 = vadd.f32 %v3897_v47, %v1816_v26  ;;  %v3934_v44 = vpop.eup %2605  ;;  %2631 = vpow2.f32 %v1684_v31  ;;  %v5130_v26 = vld [vmem:[#allocation15_spill] sm:$0xff]  ;;  %v1708_v13 = vmul.f32 1.442695, %v5137_v25 }
 0x303   : > { %5127 = vst [vmem:[#allocation53_spill] sm:$0xff] %v3934_v44  ;;  %v1441_v0 = vsub.f32 %v5130_v26, %v3822_v19  ;;  %v5135_v26 = vsub.f32 %v5116_v1, %v3707_v33  ;;  %v1716_v25 = vmul.f32 1.442695, %v5141_v63  ;;  %v5153_v50 = vsub.f32 %v3379_v21, %v3707_v33 }
 0x304   : > { %v1796_v59 = vadd.f32 %v1795_v40, %v1794_v23  ;;  %v3944_v23 = vpop.eup %2607  ;;  %v1818_v28 = vadd.f32 %v3908_v39, %v1817_v6  ;;  %v1839_v40 = vadd.f32 %v3934_v44, %v1838_v45 }
 0x305   : > { %v3950_v24 = vpop.eup %2609  ;;  %v1704_v52 = vmul.f32 1.442695, %v5135_v26  ;;  %v1634_v26 = vmul.f32 1.442695, %v1441_v0 }
 0x306   : > { %2633 = vrcp.f32 %v1796_v59  ;;  %5131 = vst [vmem:[#allocation57_spill] sm:$0xff] %v3950_v24  ;;  %v5134_v59 = vld [vmem:[#allocation19_spill] sm:$0xff]  ;;  %v3960_v6 = vpop.eup %2611  ;;  %v1819_v45 = vadd.f32 %v3919_v18, %v1818_v28 }
 0x307   : > { %2635 = vpow2.f32 %v3817_v4  ;;  %v1443_v3 = vsub.f32 %v5134_v59, %v3822_v19  ;;  %v1840_v4 = vadd.f32 %v3950_v24, %v1839_v40  ;;  %v3967_v62 = vpop.eup %2613  ;;  %v5138_v59 = vsub.f32 %v5013_v36, %v3707_v33  ;;  %v5139_v28 = vld [vmem:[#allocation23_spill] sm:$0xff] }
 0x308   : > { %2637 = vpow2.f32 %v1688_v9  ;;  %5136 = vst [vmem:[#allocation60_spill] sm:$0xff] %v3967_v62  ;;  %v1445_v9 = vsub.f32 %v5139_v28, %v3822_v19  ;;  %v3977_v46 = vpop.eup %2615  ;;  %v1820_v1 = vadd.f32 %v3930_v41, %v1819_v45  ;;  %v5142_v36 = vld [vmem:[#allocation27_spill] sm:$0xff] }
 0x309   : > { %2639 = vpow2.f32 %v1692_v29  ;;  %v1712_v31 = vmul.f32 1.442695, %v5138_v59  ;;  %v1841_v40 = vadd.f32 %v3967_v62, %v1840_v4  ;;  %v3981_v29 = vpop.eup %2617  ;;  %v1447_v59 = vsub.f32 %v5142_v36, %v3822_v19 }
 0x30a   : > { %2641 = vpow2.f32 %v1696_v8  ;;  %5140 = vst [vmem:[#allocation63_spill] sm:$0xff] %v3981_v29  ;;  %v1638_v22 = vmul.f32 1.442695, %v1443_v3  ;;  %v3988_v28 = vpop.eup %2619  ;;  %v1821_v12 = vadd.f32 %v3944_v23, %v1820_v1  ;;  %v5143_v8 = vsub.f32 %v3295_v54, %v3707_v33  ;;  %v5146_v3 = vld [vmem:[#allocation31_spill] sm:$0xff] }
 0x30b   : > { %2643 = vpow2.f32 %v1700_v49  ;;  %v1842_v45 = vadd.f32 %v3981_v29, %v1841_v40  ;;  %v3995_v49 = vpop.eup %2621  ;;  %v1724_v4 = vmul.f32 1.442695, %v5145_v2  ;;  %v1449_v63 = vsub.f32 %v5146_v3, %v3822_v19  ;;  %v5150_v2 = vld [vmem:[#allocation35_spill] sm:$0xff] }
 0x30c   : > { %2645 = vpow2.f32 %v1704_v52  ;;  %v1720_v0 = vmul.f32 1.442695, %v5143_v8  ;;  %5144 = vst [vmem:[#allocation66_spill] sm:$0xff] %v3995_v49  ;;  %v1642_v36 = vmul.f32 1.442695, %v1445_v9  ;;  %v4002_v44 = vpop.eup %2623  ;;  %v1822_v52 = vadd.f32 %v3960_v6, %v1821_v12 }
 0x30d   : > { %2647 = vpow2.f32 %v1708_v13  ;;  %v5147_v54 = vsub.f32 %v3327_v51, %v3707_v33  ;;  %v1843_v40 = vadd.f32 %v3995_v49, %v1842_v45  ;;  %v4009_v13 = vpop.eup %2625  ;;  %v1732_v8 = vmul.f32 1.442695, %v5149_v27 }
 0x30e   : > { %2649 = vpow2.f32 %v1634_v26  ;;  %5148 = vst [vmem:[#allocation69_spill] sm:$0xff] %v4009_v13  ;;  %v1451_v9 = vsub.f32 %v5150_v2, %v3822_v19  ;;  %v1646_v3 = vmul.f32 1.442695, %v1447_v59  ;;  %v4016_v24 = vpop.eup %2627  ;;  %v1823_v12 = vadd.f32 %v3977_v46, %v1822_v52 }
 0x30f   : > { %v1728_v1 = vmul.f32 1.442695, %v5147_v54  ;;  %2651 = vpow2.f32 %v1638_v22  ;;  %v5151_v51 = vsub.f32 %v3359_v55, %v3707_v33  ;;  %v1844_v45 = vadd.f32 %v4009_v13, %v1843_v40  ;;  %v4023_v54 = vpop.eup %2629  ;;  %v5154_v22 = vld [vmem:[#allocation39_spill] sm:$0xff] }
 0x310   : > { %2653 = vpow2.f32 %v1712_v31  ;;  %5152 = vst [vmem:[#allocation72_spill] sm:$0xff] %v4023_v54  ;;  %v4028_v27 = vmul.f32 1.442695, %v5153_v50  ;;  %v1453_v59 = vsub.f32 %v5154_v22, %v3822_v19  ;;  %v1650_v2 = vmul.f32 1.442695, %v1449_v63  ;;  %v4032_v52 = vpop.eup %2631  ;;  %v5158_v63 = vld [vmem:[#allocation43_spill] sm:$0xff] }
 0x311   : > { %v1736_v26 = vmul.f32 1.442695, %v5151_v51  ;;  %2655 = vpow2.f32 %v1642_v36  ;;  %5155 = vst [vmem:[#allocation75_spill] sm:$0xff] %v4032_v52  ;;  %v1824_v31 = vadd.f32 %v3988_v28, %v1823_v12  ;;  %v5156_v55 = vsub.f32 %v5125_v16, %v3707_v33 }
 0x312   : > { %2657 = vpow2.f32 %v1716_v25  ;;  %v1845_v51 = vadd.f32 %v4023_v54, %v1844_v45  ;;  %v5157_v50 = vsub.f32 %v5126_v60, %v3707_v33  ;;  %v1455_v36 = vsub.f32 %v5158_v63, %v3822_v19  ;;  %v5160_v60 = vld [vmem:[#allocation47_spill] sm:$0xff] }
 0x313   : > { %v4038_v40 = vmul.f32 1.442695, %v5156_v55  ;;  %v4041_v21 = vpop.eup %2633  ;;  %2659 = vpow2.f32 %v1646_v3  ;;  %v1654_v12 = vmul.f32 1.442695, %v1451_v9  ;;  %v1825_v16 = vadd.f32 %v4002_v44, %v1824_v31 }
 0x314   : > { %v4046_v22 = vmul.f32 1.442695, %v5157_v50  ;;  %v4050_v25 = vpop.eup %2635  ;;  %2661 = vpow2.f32 %v1720_v0  ;;  %v1846_v55 = vadd.f32 %v4032_v52, %v1845_v51  ;;  %v4056_v45 = vmul.f32 %v4041_v21, %v3626_v38  ;;  %v5162_v38 = vld [vmem:[#allocation51_spill] sm:$0xff]  ;;  %v5167_v52 = vld [vmem:[#allocation65_spill] sm:$0xff] }
 0x315   : > { %v4058_v62 = vpop.eup %2637  ;;  %v1457_v50 = vsub.f32 %v5160_v60, %v3822_v19  ;;  %2663 = vpow2.f32 %v1650_v2  ;;  %v1658_v63 = vmul.f32 1.442695, %v1453_v59  ;;  %v4064_v9 = vmul.f32 %v4041_v21, %v3621_v58  ;;  %v5164_v60 = vld [vmem:[#allocation55_spill] sm:$0xff] }
 0x316   : > { %5159 = vst [vmem:[#allocation78_spill] sm:$0xff] %v4058_v62  ;;  %v4066_v3 = vpop.eup %2639  ;;  %v1826_v0 = vadd.f32 %v4016_v24, %v1825_v16  ;;  %2665 = vpow2.f32 %v1724_v4  ;;  %v1847_v31 = vadd.f32 %v4058_v62, %v1846_v55  ;;  %v1459_v51 = vsub.f32 %v5162_v38, %v3822_v19  ;;  %v5165_v59 = vld [vmem:[#allocation59_spill] sm:$0xff]  ;;  %v5166_v55 = vld [vmem:[#allocation62_spill] sm:$0xff]  ;;  %v5168_v62 = vld [vmem:[#allocation68_spill] sm:$0xff] }
 0x317   : > { %5161 = vst [vmem:[#allocation81_spill] sm:$0xff] %v4066_v3  ;;  %v4072_v29 = vpop.eup %2641  ;;  %v1461_v2 = vsub.f32 %v5164_v60, %v3822_v19  ;;  %v1463_v49 = vsub.f32 %v5165_v59, %v3822_v19  ;;  %2667 = vpow2.f32 %v1654_v12  ;;  %v1662_v58 = vmul.f32 1.442695, %v1455_v36 }
 0x318   : > { %5163 = vst [vmem:[#allocation93_spill] sm:$0xff] %v4072_v29  ;;  %v4078_v13 = vpop.eup %2643  ;;  %v1827_v16 = vadd.f32 %v4050_v25, %v1826_v0  ;;  %2669 = vpow2.f32 %v1728_v1  ;;  %v1848_v4 = vadd.f32 %v4066_v3, %v1847_v31  ;;  %v1465_v38 = vsub.f32 %v5166_v55, %v3822_v19  ;;  %v5169_v0 = vld [vmem:[#allocation71_spill] sm:$0xff] }
 0x319   : > { %v4084_v54 = vpop.eup %2645  ;;  %v1467_v60 = vsub.f32 %v5167_v52, %v3822_v19  ;;  %v1469_v59 = vsub.f32 %v5168_v62, %v3822_v19  ;;  %2671 = vpow2.f32 %v1658_v63  ;;  %v1666_v36 = vmul.f32 1.442695, %v1457_v50 }
 0x31a   : > { %v4090_v12 = vpop.eup %2647  ;;  %v1828_v7 = vrot.slane %v1827_v16, 4  ;;  %2673 = vpow2.f32 %v1732_v8  ;;  %v1849_v1 = vadd.f32 %v4072_v29, %v1848_v4  ;;  %v1471_v31 = vsub.f32 %v5169_v0, %v3822_v19 }
 0x31b   : > { %v4095_v55 = vpop.eup %2649  ;;  %2675 = vpow2.f32 %v1662_v58  ;;  %v1670_v3 = vmul.f32 1.442695, %v1459_v51  ;;  %v1674_v57 = vmul.f32 1.442695, %v1461_v2  ;;  %v1678_v52 = vmul.f32 1.442695, %v1463_v49 }
 0x31c   : > { %5170 = vst [vmem:[#allocation84_spill] sm:$0xff] %v4095_v55  ;;  %v4097_v35 = vpop.eup %2651  ;;  %v1829_v62 = vadd.f32 %v1828_v7, %v1827_v16  ;;  %2677 = vpow2.f32 %v1736_v26  ;;  %v1850_v50 = vadd.f32 %v4078_v13, %v1849_v1  ;;  %v4102_v8 = vmul.f32 %v4041_v21, %v3824_v37 }
 0x31d   : > { %5171 = vst [vmem:[#allocation15_spill] sm:$0xff] %v4097_v35  ;;  %v4104_v63 = vpop.eup %2653  ;;  %2679 = vpow2.f32 %v1666_v36  ;;  %v1871_v4 = vadd.f32 %v4097_v35, %v4095_v55  ;;  %v4110_v51 = vmul.f32 %v4041_v21, %v3808_v32  ;;  %v4114_v7 = vmul.f32 %v4041_v21, %v3790_v53 }
 0x31e   : > { %v4116_v49 = vpop.eup %2655  ;;  %v1830_v26 = vrot.slane %v1829_v62, 2  ;;  %v1851_v37 = vadd.f32 %v4084_v54, %v1850_v50  ;;  %v1682_v2 = vmul.f32 1.442695, %v1465_v38  ;;  %v4121_v58 = vmul.f32 %v4041_v21, %v3776_v10 }
 0x31f   : > { %5172 = vst [vmem:[#allocation10_spill] sm:$0xff] %v4116_v49  ;;  %v4123_v16 = vpop.eup %2657  ;;  %2681 = vpow2.f32 %v1670_v3  ;;  %v1872_v32 = vadd.f32 %v4116_v49, %v1871_v4  ;;  %v4128_v36 = vmul.f32 %v4041_v21, %v3758_v20  ;;  %v4132_v53 = vmul.f32 %v4041_v21, %v3743_v61 }
 0x320   : > { %v4134_v1 = vpop.eup %2659  ;;  %v1831_v38 = vadd.f32 %v1830_v26, %v1829_v62  ;;  %2683 = vpow2.f32 %v4028_v27  ;;  %v1852_v10 = vadd.f32 %v4090_v12, %v1851_v37  ;;  %v4140_v3 = vmul.f32 %v4041_v21, %v3725_v30 }
 0x321   : > { %5173 = vst [vmem:[#allocation19_spill] sm:$0xff] %v4134_v1  ;;  %v4142_v0 = vpop.eup %2661  ;;  %2685 = vpow2.f32 %v1674_v57  ;;  %v1873_v20 = vadd.f32 %v4134_v1, %v1872_v32  ;;  %v4147_v61 = vmul.f32 %v4041_v21, %v3716_v11  ;;  %v4151_v62 = vmul.f32 %v4041_v21, %v3709_v14 }
 0x322   : > { %5174 = vst [vmem:[#allocation23_spill] sm:$0xff] %v4140_v3  ;;  %v4153_v27 = vpop.eup %2663  ;;  %v1832_v50 = vrot.slane %v1831_v38, 1  ;;  %2687 = vpow2.f32 %v4038_v40  ;;  %v1853_v30 = vadd.f32 %v4104_v63, %v1852_v10  ;;  %v4159_v57 = vmul.f32 %v4041_v21, %v3699_v43 }
 0x323   : > { %5175 = vst [vmem:[#allocation27_spill] sm:$0xff] %v4147_v61  ;;  %5176 = vst [vmem:[#allocation31_spill] sm:$0xff] %v4151_v62  ;;  %v4161_v4 = vpop.eup %2665  ;;  %2689 = vpow2.f32 %v1678_v52  ;;  %v1686_v11 = vmul.f32 1.442695, %v1467_v60  ;;  %v1874_v26 = vadd.f32 %v4153_v27, %v1873_v20  ;;  %v4166_v14 = vmul.f32 %v4041_v21, %v3686_v15  ;;  %v5182_v60 = vld [vmem:[#allocation74_spill] sm:$0xff] }
 0x324   : > { %5177 = vst [vmem:[#allocation35_spill] sm:$0xff] %v4153_v27  ;;  %5178 = vst [vmem:[#allocation39_spill] sm:$0xff] %v4159_v57  ;;  %v4168_v37 = vpop.eup %2667  ;;  %v1833_v32 = vadd.f32 %v1832_v50, %v1831_v38  ;;  %2691 = vpow2.f32 %v4046_v22  ;;  %v5181_v40 = vsub.f32 %v3445_v48, %v3707_v33  ;;  %v1854_v10 = vadd.f32 %v4123_v16, %v1853_v30  ;;  %v5185_v30 = vld [vmem:[#allocation77_spill] sm:$0xff] }
 0x325   : > { %5179 = vst [vmem:[#allocation43_spill] sm:$0xff] %v4166_v14  ;;  %5180 = vst [vmem:[#allocation47_spill] sm:$0xff] %v4168_v37  ;;  %v4175_v29 = vpop.eup %2669  ;;  %v1473_v52 = vsub.f32 %v5182_v60, %v3822_v19  ;;  %2693 = vpow2.f32 %v1682_v2  ;;  %v1690_v20 = vmul.f32 1.442695, %v1469_v59  ;;  %v1875_v15 = vadd.f32 %v4168_v37, %v1874_v26  ;;  %v5193_v14 = vld [vmem:[#allocation88_spill] sm:$0xff] }
 0x326   : > { %v1752_v43 = vmul.f32 1.442695, %v5181_v40  ;;  %v4180_v55 = vpop.eup %2671  ;;  %2695 = vrcp.f32 %v1833_v32  ;;  %v5184_v22 = vsub.f32 %v5132_v34, %v3707_v33  ;;  %v1855_v48 = vadd.f32 %v4142_v0, %v1854_v10  ;;  %v5187_v33 = vld [vmem:[#allocation80_spill] sm:$0xff] }
 0x327   : > { %5183 = vst [vmem:[#allocation51_spill] sm:$0xff] %v4180_v55  ;;  %v4186_v50 = vpop.eup %2673  ;;  %v1475_v40 = vsub.f32 %v5185_v30, %v3822_v19  ;;  %2697 = vpow2.f32 %v1686_v11  ;;  %v1694_v60 = vmul.f32 1.442695, %v1471_v31  ;;  %v1876_v59 = vadd.f32 %v4180_v55, %v1875_v15  ;;  %v5189_v11 = vld [vmem:[#allocation83_spill] sm:$0xff] }
 0x328   : > { %v1756_v38 = vmul.f32 1.442695, %v5184_v22  ;;  %v4191_v2 = vpop.eup %2675  ;;  %2699 = vpow2.f32 %v1752_v43  ;;  %v1856_v26 = vadd.f32 %v4161_v4, %v1855_v48  ;;  %v1477_v34 = vsub.f32 %v5187_v33, %v3822_v19 }
 0x329   : > { %5186 = vst [vmem:[#allocation55_spill] sm:$0xff] %v4191_v2  ;;  %v4194_v32 = vpop.eup %2677  ;;  %2701 = vpow2.f32 %v1690_v20  ;;  %v1698_v10 = vmul.f32 1.442695, %v1473_v52  ;;  %v1877_v22 = vadd.f32 %v4191_v2, %v1876_v59  ;;  %v1479_v15 = vsub.f32 %v5189_v11, %v3822_v19  ;;  %v5190_v52 = vld [vmem:[#allocation85_spill] sm:$0xff]  ;;  %v5192_v11 = vld [vmem:[#allocation87_spill] sm:$0xff] }
 0x32a   : > { %v4199_v35 = vpop.eup %2679  ;;  %2703 = vpow2.f32 %v1756_v38  ;;  %v1857_v31 = vadd.f32 %v4175_v29, %v1856_v26  ;;  %v1702_v43 = vmul.f32 1.442695, %v1475_v40  ;;  %v1481_v59 = vsub.f32 %v5190_v52, %v3822_v19  ;;  %v5191_v40 = vld [vmem:[#allocation86_spill] sm:$0xff] }
 0x32b   : > { %5188 = vst [vmem:[#allocation59_spill] sm:$0xff] %v4199_v35  ;;  %2705 = vpow2.f32 %v1694_v60  ;;  %v1878_v48 = vadd.f32 %v4199_v35, %v1877_v22  ;;  %v1706_v38 = vmul.f32 1.442695, %v1477_v34  ;;  %v1483_v22 = vsub.f32 %v5191_v40, %v3822_v19  ;;  %v5194_v40 = vld [vmem:[#allocation89_spill] sm:$0xff] }
 0x32c   : > { %v4205_v30 = vpop.eup %2681  ;;  %v1858_v33 = vadd.f32 %v4186_v50, %v1857_v31  ;;  %2707 = vpow2.f32 %v1698_v10  ;;  %v1485_v1 = vsub.f32 %v5192_v11, %v3822_v19  ;;  %v1487_v27 = vsub.f32 %v5193_v14, %v3822_v19 }
 0x32d   : > { %v4208_v20 = vpop.eup %2683  ;;  %v1879_v26 = vadd.f32 %v4205_v30, %v1878_v48  ;;  %2709 = vpow2.f32 %v1702_v43  ;;  %v1710_v10 = vmul.f32 1.442695, %v1479_v15  ;;  %v1489_v57 = vsub.f32 %v5194_v40, %v3822_v19  ;;  %v5195_v15 = vld [vmem:[#allocation90_spill] sm:$0xff] }
 0x32e   : > { %v4213_v49 = vpop.eup %2685  ;;  %v1859_v60 = vadd.f32 %v4194_v32, %v1858_v33  ;;  %2711 = vpow2.f32 %v1706_v38  ;;  %v1714_v11 = vmul.f32 1.442695, %v1481_v59  ;;  %v1491_v43 = vsub.f32 %v5195_v15, %v3822_v19 }
 0x32f   : > { %v4220_v31 = vpop.eup %2687  ;;  %v1880_v34 = vadd.f32 %v4213_v49, %v1879_v26  ;;  %v5196_v26 = vld [vmem:[#allocation91_spill] sm:$0xff]  ;;  %2713 = vpow2.f32 %v1710_v10  ;;  %v1722_v2 = vmul.f32 1.442695, %v1485_v1  ;;  %v1726_v40 = vmul.f32 1.442695, %v1487_v27 }
 0x330   : > { %v4225_v48 = vpop.eup %2689  ;;  %v1860_v52 = vadd.f32 %v4208_v20, %v1859_v60  ;;  %v1493_v55 = vsub.f32 %v5196_v26, %v3822_v19  ;;  %v1718_v60 = vmul.f32 1.442695, %v1483_v22  ;;  %2715 = vpow2.f32 %v1714_v11 }
 0x331   : > { %v4228_v33 = vpop.eup %2691  ;;  %v1881_v37 = vadd.f32 %v4225_v48, %v1880_v34  ;;  %v1730_v1 = vmul.f32 1.442695, %v1489_v57  ;;  %v1734_v35 = vmul.f32 1.442695, %v1491_v43 }
 0x332   : > { %v4233_v62 = vpop.eup %2693  ;;  %v1861_v14 = vadd.f32 %v4220_v31, %v1860_v52  ;;  %2717 = vpow2.f32 %v1718_v60  ;;  %v1938_v60 = vmul.f32 %v4041_v21, %v3613_v56 }
 0x333   : > { %v4240_v61 = vpop.eup %2695  ;;  %v1882_v59 = vadd.f32 %v4233_v62, %v1881_v37  ;;  %2719 = vpow2.f32 %v1722_v2 }
 0x334   : > { %v4243_v38 = vpop.eup %2697  ;;  %v1862_v34 = vadd.f32 %v4228_v33, %v1861_v14  ;;  %v1943_v52 = vmul.f32 %v4240_v61, %v3840_v42  ;;  %v1941_v15 = vmul.f32 %v4240_v61, %v3836_v17  ;;  %v1939_v22 = vmul.f32 %v4240_v61, %v3828_v5  ;;  %v5197_v14 = vld [vmem:[#allocation92_spill] sm:$0xff]  ;;  %v5198_v17 = vld [vmem:[#allocation94_spill] sm:$0xff] }
 0x335   : > { %v4252_v26 = vpop.eup %2699  ;;  %v1883_v27 = vadd.f32 %v4243_v38, %v1882_v59  ;;  %v1495_v3 = vsub.f32 %v5197_v14, %v3822_v19  ;;  %v1497_v5 = vsub.f32 %v5198_v17, %v3822_v19  ;;  %2721 = vpow2.f32 %v1726_v40  ;;  %v5206_v14 = vld [vmem:[#allocation21_spill] sm:$0xff] }
 0x336   : > { %v4255_v37 = vpop.eup %2701  ;;  %v1863_v10 = vadd.f32 %v4252_v26, %v1862_v34  ;;  %2040 = vmatprep.subr.mxu1 %v1943_v52  ;;  %v1738_v34 = vmul.f32 1.442695, %v1493_v55  ;;  %2723 = vpow2.f32 %v1730_v1  ;;  %v4274_v2 = vmul.f32 %v4240_v61, %v4050_v25 }
 0x337   : > { %v4260_v42 = vpop.eup %2703  ;;  %v1884_v57 = vadd.f32 %v4255_v37, %v1883_v27  ;;  %2041 = vmatpush1.xpose.msra.mxu1 %v4056_v45  ;;  %v4278_v45 = vmul.f32 %v4240_v61, %v4016_v24  ;;  %v4284_v55 = vmul.f32 %v4240_v61, %v4002_v44  ;;  %v4288_v56 = vmul.f32 %v4240_v61, %v3988_v28 }
 0x338   : > { %v4266_v11 = vpop.eup %2705  ;;  %v1864_v59 = vadd.f32 %v4260_v42, %v1863_v10  ;;  %2042 = vmatprep.subr.mxu1 %v1941_v15  ;;  %v4292_v40 = vmul.f32 %v4240_v61, %v3977_v46  ;;  %v4298_v24 = vmul.f32 %v4240_v61, %v3960_v6  ;;  %v4302_v44 = vmul.f32 %v4240_v61, %v3944_v23 }
 0x339   : > { %v1885_v52 = vadd.f32 %v4266_v11, %v1884_v57  ;;  %v4280_v43 = vpop.eup %2707  ;;  %v4306_v28 = vmul.f32 %v4240_v61, %v3930_v41  ;;  %v4312_v1 = vmul.f32 %v4240_v61, %v3919_v18  ;;  %v4316_v6 = vmul.f32 %v4240_v61, %v3908_v39  ;;  %v5204_v41 = vld [vmem:[#allocation33_spill] sm:$0xff] }
 0x33a   : > { %5199 = vst [vmem:[#allocation62_spill] sm:$0xff] %v4280_v43  ;;  %v1865_v27 = vrot.slane %v1864_v59, 4  ;;  %v4308_v15 = vpop.eup %2709  ;;  %v4320_v23 = vmul.f32 %v4240_v61, %v3897_v47  ;;  %v4325_v10 = vmul.f32 %v4240_v61, %v5204_v41  ;;  %v5208_v18 = vld [vmem:[#allocation17_spill] sm:$0xff]  ;;  %2725 = vpow2.f32 %v1734_v35 }
 0x33b   : > { %v1886_v25 = vadd.f32 %v4280_v43, %v1885_v52  ;;  %2043 = vmatpush1.xpose.msra.mxu1 %v4064_v9  ;;  %5200 = vst [vmem:[#allocation65_spill] sm:$0xff] %v4306_v28  ;;  %5201 = vst [vmem:[#allocation68_spill] sm:$0xff] %v4312_v1  ;;  %v4333_v17 = vmul.f32 %v4240_v61, %v5208_v18  ;;  %v4335_v39 = vpop.eup %2711  ;;  %v5211_v52 = vld [vmem:[#allocation95_spill] sm:$0xff]  ;;  %v5212_v18 = vld [vmem:[#allocation96_spill] sm:$0xff]  ;;  %2727 = vpow2.f32 %v1738_v34 }
 0x33c   : > { %v1866_v46 = vadd.f32 %v1865_v27, %v1864_v59  ;;  %2044 = vmatprep.subr.mxu1 %v1939_v22  ;;  %5202 = vst [vmem:[#allocation71_spill] sm:$0xff] %v4316_v6  ;;  %5203 = vst [vmem:[#allocation74_spill] sm:$0xff] %v4320_v23  ;;  %v4329_v22 = vmul.f32 %v4240_v61, %v5206_v14  ;;  %v5210_v59 = vld [vmem:[#allocation79_spill] sm:$0xff]  ;;  %v1499_v27 = vsub.f32 %v5211_v52, %v3822_v19  ;;  %v4342_v14 = vpop.eup %2713 }
 0x33d   : > { %v1887_v9 = vadd.f32 %v4308_v15, %v1886_v25  ;;  %5205 = vst [vmem:[#allocation77_spill] sm:$0xff] %v4325_v10  ;;  %5209 = vst [vmem:[#allocation83_spill] sm:$0xff] %v4333_v17  ;;  %v1937_v47 = vmul.f32 %v4240_v61, %v5210_v59  ;;  %v1742_v25 = vmul.f32 1.442695, %v1495_v3  ;;  %v1501_v17 = vsub.f32 %v5212_v18, %v3822_v19  ;;  %v5213_v59 = vld [vmem:[#allocation14_spill] sm:$0xff]  ;;  %v4349_v52 = vpop.eup %2715  ;;  %v5214_v3 = vld [vmem:[#allocation76_spill] sm:$0xff] }
 0x33e   : > { %5207 = vst [vmem:[#allocation80_spill] sm:$0xff] %v4329_v22  ;;  %v1867_v57 = vrot.slane %v1866_v46, 2  ;;  %v1746_v22 = vmul.f32 1.442695, %v1497_v5  ;;  %v1936_v23 = vmul.f32 %v4041_v21, %v5213_v59  ;;  %v5216_v6 = vld [vmem:[#allocation11_spill] sm:$0xff] }
 0x33f   : > { %v1888_v41 = vadd.f32 %v4335_v39, %v1887_v9  ;;  %2045 = vmatpush1.xpose.msra.mxu1 %v1938_v60  ;;  %v1935_v60 = vmul.f32 %v4240_v61, %v5214_v3  ;;  %v4353_v9 = vpop.eup %2717  ;;  %2729 = vpow2.f32 %v1742_v25  ;;  %v1754_v59 = vmul.f32 1.442695, %v1501_v17  ;;  %v5219_v25 = vld [vmem:[#allocation70_spill] sm:$0xff] }
 0x340   : > { %v1868_v43 = vadd.f32 %v1867_v57, %v1866_v46  ;;  %2046 = vmatprep.subr.mxu1 %v1937_v47  ;;  %v5215_v46 = vld [vmem:[#allocation12_spill] sm:$0xff]  ;;  %v1750_v47 = vmul.f32 1.442695, %v1499_v27  ;;  %v4358_v34 = vpop.eup %2719  ;;  %2731 = vpow2.f32 %v1746_v22  ;;  %v1934_v1 = vmul.f32 %v4041_v21, %v5216_v6 }
 0x341   : > { %v1889_v10 = vadd.f32 %v4342_v14, %v1888_v41  ;;  %v1503_v57 = vsub.f32 %v5215_v46, %v3822_v19  ;;  %v5217_v19 = vld [vmem:[#allocation73_spill] sm:$0xff]  ;;  %v5218_v22 = vld [vmem:[#allocation56_spill] sm:$0xff]  ;;  %v1931_v6 = vmul.f32 %v4240_v61, %v5219_v25 }
 0x342   : > { %v1869_v35 = vrot.slane %v1868_v43, 1  ;;  %v4360_v18 = vpop.eup %2721  ;;  %v1933_v27 = vmul.f32 %v4240_v61, %v5217_v19  ;;  %2733 = vpow2.f32 %v1750_v47  ;;  %v1932_v17 = vmul.f32 %v4041_v21, %v5218_v22  ;;  %v5220_v46 = vld [vmem:[#allocation52_spill] sm:$0xff] }
 0x343   : > { %v1890_v5 = vadd.f32 %v4349_v52, %v1889_v10  ;;  %2047 = vmatpush1.xpose.msra.mxu1 %v1936_v23  ;;  %v4365_v28 = vpop.eup %2723  ;;  %v1758_v23 = vmul.f32 1.442695, %v1503_v57  ;;  %v1930_v57 = vmul.f32 %v4041_v21, %v5220_v46 }
 0x344   : > { %v1870_v41 = vadd.f32 %v1869_v35, %v1868_v43  ;;  %2048 = vmatprep.subr.mxu1 %v1935_v60 }
 0x345   : > { %v1891_v3 = vadd.f32 %v4353_v9, %v1890_v5  ;;  %v5221_v5 = vld [vmem:[#allocation67_spill] sm:$0xff] }
 0x346   : > { %2735 = vrcp.f32 %v1870_v41  ;;  %v1929_v41 = vmul.f32 %v4240_v61, %v5221_v5  ;;  %v5225_v5 = vld [vmem:[#allocation61_spill] sm:$0xff] }
 0x347   : > { %v1892_v10 = vadd.f32 %v4358_v34, %v1891_v3  ;;  %2049 = vmatpush1.xpose.msra.mxu1 %v1934_v1  ;;  %2737 = vpow2.f32 %v1754_v59  ;;  %v4376_v60 = vpop.eup %2725 }
 0x348   : > { %2050 = vmatprep.subr.mxu1 %v1933_v27  ;;  %2739 = vpow2.f32 %v1758_v23  ;;  %v4381_v47 = vpop.eup %2727  ;;  %v5222_v27 = vld [vmem:[#allocation48_spill] sm:$0xff] }
 0x349   : > { %v1893_v43 = vadd.f32 %v4360_v18, %v1892_v10  ;;  %v1928_v23 = vmul.f32 %v4041_v21, %v5222_v27  ;;  %v5226_v27 = vld [vmem:[#allocation40_spill] sm:$0xff] }
 0x34b   : > { %v1894_v35 = vadd.f32 %v4365_v28, %v1893_v43  ;;  %2051 = vmatpush1.xpose.msra.mxu1 %v1932_v17  ;;  %v5223_v43 = vld [vmem:[#allocation64_spill] sm:$0xff] }
 0x34c   : > { %2052 = vmatprep.subr.mxu1 %v1931_v6  ;;  %v4386_v3 = vpop.eup %2729  ;;  %v1927_v22 = vmul.f32 %v4240_v61, %v5223_v43  ;;  %v5227_v43 = vld [vmem:[#allocation58_spill] sm:$0xff] }
 0x34d   : > { %v1895_v1 = vadd.f32 %v4376_v60, %v1894_v35  ;;  %v4391_v10 = vpop.eup %2731 }
 0x34f   : > { %v1896_v59 = vadd.f32 %v4381_v47, %v1895_v1  ;;  %2053 = vmatpush1.xpose.msra.mxu1 %v1930_v57  ;;  %v4396_v25 = vpop.eup %2733  ;;  %v5224_v1 = vld [vmem:[#allocation44_spill] sm:$0xff] }
 0x350   : > { %2054 = vmatprep.subr.mxu1 %v1929_v41  ;;  %v1926_v46 = vmul.f32 %v4041_v21, %v5224_v1  ;;  %v1925_v41 = vmul.f32 %v4240_v61, %v5225_v5 }
 0x351   : > { %v1897_v19 = vadd.f32 %v4386_v3, %v1896_v59 }
 0x353   : > { %v1898_v17 = vadd.f32 %v4391_v10, %v1897_v19  ;;  %2055 = vmatpush1.xpose.msra.mxu1 %v1928_v23  ;;  %v4398_v6 = vpop.eup %2735  ;;  %v1924_v23 = vmul.f32 %v4041_v21, %v5226_v27 }
 0x354   : > { %2056 = vmatprep.subr.mxu1 %v1927_v22  ;;  %v4403_v57 = vpop.eup %2737  ;;  %v1923_v22 = vmul.f32 %v4240_v61, %v5227_v43  ;;  %v4418_v1 = vmul.f32 %v4398_v6, %v4252_v26  ;;  %v4438_v26 = vmul.f32 %v4398_v6, %v4186_v50  ;;  %v4458_v50 = vmul.f32 %v4398_v6, %v4104_v63  ;;  %v5233_v43 = vld [vmem:[#allocation54_spill] sm:$0xff] }
 0x355   : > { %v1899_v35 = vadd.f32 %v4396_v25, %v1898_v17  ;;  %v2740_v19 = vpop.eup %2739  ;;  %v4414_v17 = vmul.f32 %v4398_v6, %v4260_v42  ;;  %v4434_v42 = vmul.f32 %v4398_v6, %v4194_v32  ;;  %v4454_v32 = vmul.f32 %v4398_v6, %v4123_v16  ;;  %v5232_v16 = vld [vmem:[#allocation36_spill] sm:$0xff] }
 0x356   : > { %5229 = vst [vmem:[#allocation86_spill] sm:$0xff] %v4458_v50  ;;  %v1921_v63 = vmul.f32 %v4240_v61, %v5233_v43 }
 0x357   : > { %v1900_v59 = vadd.f32 %v4403_v57, %v1899_v35  ;;  %2057 = vmatpush1.xpose.msra.mxu1 %v1926_v46  ;;  %v4422_v35 = vmul.f32 %v4398_v6, %v4228_v33  ;;  %v4426_v46 = vmul.f32 %v4398_v6, %v4220_v31  ;;  %v4442_v33 = vmul.f32 %v4398_v6, %v4175_v29 }
 0x358   : > { %2058 = vmatprep.subr.mxu1 %v1925_v41  ;;  %v4430_v41 = vmul.f32 %v4398_v6, %v4208_v20  ;;  %v4446_v31 = vmul.f32 %v4398_v6, %v4161_v4  ;;  %v4450_v20 = vmul.f32 %v4398_v6, %v4142_v0  ;;  %5228 = vst [vmem:[#allocation85_spill] sm:$0xff] %v4454_v32 }
 0x359   : > { %v1901_v5 = vadd.f32 %v2740_v19, %v1900_v59  ;;  %v4462_v29 = vmul.f32 %v4398_v6, %v4090_v12  ;;  %v4466_v4 = vmul.f32 %v4398_v6, %v4084_v54  ;;  %v4470_v0 = vmul.f32 %v4398_v6, %v4078_v13  ;;  %v5235_v54 = vld [vmem:[#allocation50_spill] sm:$0xff] }
 0x35b   : > { %v1902_v59 = vrot.slane %v1901_v5, 4  ;;  %2059 = vmatpush1.xpose.msra.mxu1 %v1924_v23  ;;  %5230 = vst [vmem:[#allocation87_spill] sm:$0xff] %v4462_v29  ;;  %5231 = vst [vmem:[#allocation88_spill] sm:$0xff] %v4466_v4  ;;  %v1922_v23 = vmul.f32 %v4041_v21, %v5232_v16  ;;  %v5234_v29 = vld [vmem:[#allocation32_spill] sm:$0xff]  ;;  %v1919_v4 = vmul.f32 %v4240_v61, %v5235_v54  ;;  %v5237_v16 = vld [vmem:[#allocation46_spill] sm:$0xff] }
 0x35c   : > { %2060 = vmatprep.subr.mxu1 %v1923_v22  ;;  %v1920_v50 = vmul.f32 %v4041_v21, %v5234_v29  ;;  %v1917_v43 = vmul.f32 %v4240_v61, %v5237_v16  ;;  %v5239_v29 = vld [vmem:[#allocation38_spill] sm:$0xff] }
 0x35d   : > { %v1903_v27 = vadd.f32 %v1902_v59, %v1901_v5  ;;  %v5236_v5 = vld [vmem:[#allocation28_spill] sm:$0xff] }
 0x35e   : > { %v1918_v59 = vmul.f32 %v4041_v21, %v5236_v5 }
 0x35f   : > { %v1904_v22 = vrot.slane %v1903_v27, 2  ;;  %2061 = vmatpush1.xpose.msra.mxu1 %v1922_v23 }
 0x360   : > { %2062 = vmatprep.subr.mxu1 %v1921_v63  ;;  %v1915_v63 = vmul.f32 %v4240_v61, %v5239_v29 }
 0x361   : > { %v1905_v12 = vadd.f32 %v1904_v22, %v1903_v27  ;;  %v5238_v27 = vld [vmem:[#allocation24_spill] sm:$0xff] }
 0x362   : > { %v1916_v23 = vmul.f32 %v4041_v21, %v5238_v27  ;;  %v5244_v27 = vld [vmem:[#allocation78_spill] sm:$0xff] }
 0x363   : > { %v1906_v32 = vrot.slane %v1905_v12, 1  ;;  %2063 = vmatpush1.xpose.msra.mxu1 %v1920_v50  ;;  %v5240_v50 = vld [vmem:[#allocation20_spill] sm:$0xff] }
 0x364   : > { %2064 = vmatprep.subr.mxu1 %v1919_v4  ;;  %v5241_v4 = vld [vmem:[#allocation34_spill] sm:$0xff] }
 0x365   : > { %v1907_v13 = vadd.f32 %v1906_v32, %v1905_v12  ;;  %v1914_v32 = vmul.f32 %v4041_v21, %v5240_v50  ;;  %v1913_v22 = vmul.f32 %v4240_v61, %v5241_v4  ;;  %v5242_v12 = vld [vmem:[#allocation16_spill] sm:$0xff]  ;;  %v5255_v4 = vld [vmem:[#allocation27_spill] sm:$0xff] }
 0x366   : > { %v1912_v54 = vmul.f32 %v4041_v21, %v5242_v12  ;;  %v5257_v12 = vld [vmem:[#allocation68_spill] sm:$0xff] }
 0x367   : > { %2741 = vrcp.f32 %v1907_v13  ;;  %2065 = vmatpush1.xpose.msra.mxu1 %v1918_v59  ;;  %v5243_v59 = vld [vmem:[#allocation81_spill] sm:$0xff] }
 0x368   : > { %2066 = vmatprep.subr.mxu1 %v1917_v43  ;;  %v2006_v16 = vmul.f32 %v4398_v6, %v5243_v59  ;;  %v5259_v59 = vld [vmem:[#allocation31_spill] sm:$0xff] }
 0x36b   : > { %2067 = vmatpush1.xpose.msra.mxu1 %v1916_v23  ;;  %v2004_v23 = vmul.f32 %v4398_v6, %v5244_v27  ;;  %v5261_v27 = vld [vmem:[#allocation71_spill] sm:$0xff] }
 0x36c   : > { %2068 = vmatprep.subr.mxu1 %v1915_v63 }
 0x36f   : > { %2069 = vmatpush1.xpose.msra.mxu1 %v1914_v32  ;;  %v5254_v32 = vld [vmem:[#allocation55_spill] sm:$0xff] }
 0x370   : > { %2070 = vmatprep.subr.mxu1 %v1913_v22 }
 0x373   : > { %2071 = vmatpush1.xpose.msra.mxu1 %v1912_v54  ;;  %v5258_v54 = vld [vmem:[#allocation51_spill] sm:$0xff] }
 0x374   : > { %v4494_v13 = vpop.eup %2741  ;;  %2072 = vmatprep.subr.mxu1 %v4274_v2 }
 0x375   : > { %v2007_v5 = vmul.f32 %v4494_v13, %v4266_v11  ;;  %v2005_v43 = vmul.f32 %v4494_v13, %v4255_v37  ;;  %v2003_v29 = vmul.f32 %v4494_v13, %v4243_v38  ;;  %v4509_v2 = vmul.f32 %v4494_v13, %v2740_v19  ;;  %v5251_v19 = vld [vmem:[#allocation23_spill] sm:$0xff] }
 0x376   : > { %v4513_v11 = vmul.f32 %v4494_v13, %v4403_v57  ;;  %v4517_v37 = vmul.f32 %v4494_v13, %v4396_v25  ;;  %v4522_v63 = vmul.f32 %v4494_v13, %v4391_v10  ;;  %v4530_v38 = vmul.f32 %v4494_v13, %v4381_v47 }
 0x377   : > { %2111 = vmatprep.subr.mxu0 %v2007_v5  ;;  %2073 = vmatpush2.xpose.msra.mxu1 %v4102_v8  ;;  %v4526_v8 = vmul.f32 %v4494_v13, %v4386_v3  ;;  %v4534_v57 = vmul.f32 %v4494_v13, %v4376_v60  ;;  %v4538_v25 = vmul.f32 %v4494_v13, %v4365_v28 }
 0x378   : > { %2112 = vmatpush1.xpose.msra.mxu0 %v2006_v16  ;;  %2074 = vmatprep.subr.mxu1 %v4278_v45  ;;  %v4542_v45 = vmul.f32 %v4494_v13, %v4360_v18  ;;  %v4546_v3 = vmul.f32 %v4494_v13, %v4358_v34  ;;  %v4550_v47 = vmul.f32 %v4494_v13, %v4353_v9  ;;  %v5245_v9 = vld [vmem:[#allocation75_spill] sm:$0xff]  ;;  %v5260_v16 = vld [vmem:[#allocation53_spill] sm:$0xff] }
 0x379   : > { %2113 = vmatprep.subr.mxu0 %v2005_v43  ;;  %v4554_v60 = vmul.f32 %v4494_v13, %v4349_v52  ;;  %v4558_v28 = vmul.f32 %v4494_v13, %v4342_v14  ;;  %v4562_v18 = vmul.f32 %v4494_v13, %v4335_v39  ;;  %v4566_v34 = vmul.f32 %v4494_v13, %v4308_v15  ;;  %v5246_v39 = vld [vmem:[#allocation72_spill] sm:$0xff] }
 0x37a   : > { %v2002_v10 = vmul.f32 %v4398_v6, %v5245_v9  ;;  %v2001_v14 = vmul.f32 %v4494_v13, %v4233_v62  ;;  %v2000_v52 = vmul.f32 %v4398_v6, %v5246_v39  ;;  %v5248_v62 = vld [vmem:[#allocation66_spill] sm:$0xff]  ;;  %v1989_v5 = vmul.f32 %v4494_v13, %v5258_v54  ;;  %v5263_v9 = vld [vmem:[#allocation39_spill] sm:$0xff] }
 0x37b   : > { %2075 = vmatpush2.xpose.msra.mxu1 %v4110_v51  ;;  %v1999_v51 = vmul.f32 %v4494_v13, %v4225_v48  ;;  %v5249_v48 = vld [vmem:[#allocation63_spill] sm:$0xff]  ;;  %v1988_v43 = vmul.f32 %v4398_v6, %v5260_v16  ;;  %v5265_v39 = vld [vmem:[#allocation74_spill] sm:$0xff] }
 0x37c   : > { %2114 = vmatpush1.xpose.msra.mxu0 %v2004_v23  ;;  %2076 = vmatprep.subr.mxu1 %v4284_v55  ;;  %v5247_v55 = vld [vmem:[#allocation69_spill] sm:$0xff]  ;;  %v5262_v23 = vld [vmem:[#allocation47_spill] sm:$0xff]  ;;  %v5279_v54 = vld [vmem:[#allocation26_spill] sm:$0xff] }
 0x37d   : > { %2115 = vmatprep.subr.mxu0 %v2003_v29  ;;  %v1998_v15 = vmul.f32 %v4398_v6, %v5247_v55  ;;  %v1987_v29 = vmul.f32 %v4494_v13, %v5262_v23  ;;  %v5267_v55 = vld [vmem:[#allocation43_spill] sm:$0xff]  ;;  %v5282_v23 = vld [vmem:[#allocation84_spill] sm:$0xff] }
 0x37f   : > { %2077 = vmatpush2.xpose.msra.mxu1 %v4114_v7  ;;  %v1997_v7 = vmul.f32 %v4494_v13, %v4213_v49  ;;  %v5250_v49 = vld [vmem:[#allocation59_spill] sm:$0xff] }
 0x380   : > { %2116 = vmatpush1.xpose.msra.mxu0 %v2002_v10  ;;  %2078 = vmatprep.subr.mxu1 %v4288_v56  ;;  %v1996_v56 = vmul.f32 %v4398_v6, %v5248_v62  ;;  %v5264_v10 = vld [vmem:[#allocation49_spill] sm:$0xff] }
 0x381   : > { %2117 = vmatprep.subr.mxu0 %v2001_v14  ;;  %v1986_v14 = vmul.f32 %v4398_v6, %v5264_v10  ;;  %v5269_v62 = vld [vmem:[#allocation77_spill] sm:$0xff] }
 0x383   : > { %2079 = vmatpush2.xpose.msra.mxu1 %v4121_v58  ;;  %v1995_v58 = vmul.f32 %v4494_v13, %v4205_v30  ;;  %v5253_v30 = vld [vmem:[#allocation65_spill] sm:$0xff] }
 0x384   : > { %2118 = vmatpush1.xpose.msra.mxu0 %v2000_v52  ;;  %2080 = vmatprep.subr.mxu1 %v4292_v40  ;;  %v1994_v40 = vmul.f32 %v4398_v6, %v5249_v48  ;;  %v5266_v52 = vld [vmem:[#allocation35_spill] sm:$0xff]  ;;  %v5271_v48 = vld [vmem:[#allocation42_spill] sm:$0xff] }
 0x385   : > { %2119 = vmatprep.subr.mxu0 %v1999_v51  ;;  %v1985_v51 = vmul.f32 %v4494_v13, %v5266_v52  ;;  %v5285_v52 = vld [vmem:[#allocation25_spill] sm:$0xff] }
 0x387   : > { %2081 = vmatpush2.xpose.msra.mxu1 %v4128_v36  ;;  %v1993_v36 = vmul.f32 %v4494_v13, %v5250_v49  ;;  %v5272_v49 = vld [vmem:[#allocation41_spill] sm:$0xff] }
 0x388   : > { %2120 = vmatpush1.xpose.msra.mxu0 %v1998_v15  ;;  %2082 = vmatprep.subr.mxu1 %v4298_v24  ;;  %v5252_v24 = vld [vmem:[#allocation60_spill] sm:$0xff]  ;;  %v5268_v15 = vld [vmem:[#allocation45_spill] sm:$0xff] }
 0x389   : > { %2121 = vmatprep.subr.mxu0 %v1997_v7  ;;  %v1992_v50 = vmul.f32 %v4398_v6, %v5252_v24  ;;  %v1984_v7 = vmul.f32 %v4398_v6, %v5268_v15  ;;  %v5274_v24 = vld [vmem:[#allocation10_spill] sm:$0xff] }
 0x38b   : > { %2083 = vmatpush2.xpose.msra.mxu1 %v4132_v53  ;;  %v1991_v53 = vmul.f32 %v4494_v13, %v5254_v32 }
 0x38c   : > { %2122 = vmatpush1.xpose.msra.mxu0 %v1996_v56  ;;  %2084 = vmatprep.subr.mxu1 %v4302_v44  ;;  %v5256_v44 = vld [vmem:[#allocation57_spill] sm:$0xff]  ;;  %v5270_v56 = vld [vmem:[#allocation19_spill] sm:$0xff] }
 0x38d   : > { %2123 = vmatprep.subr.mxu0 %v1995_v58  ;;  %v1990_v22 = vmul.f32 %v4398_v6, %v5256_v44  ;;  %v1983_v58 = vmul.f32 %v4494_v13, %v5270_v56  ;;  %v5277_v44 = vld [vmem:[#allocation83_spill] sm:$0xff] }
 0x38f   : > { %2085 = vmatpush2.xpose.msra.mxu1 %v5251_v19  ;;  %v5273_v19 = vld [vmem:[#allocation80_spill] sm:$0xff] }
 0x390   : > { %2124 = vmatpush1.xpose.msra.mxu0 %v1994_v40  ;;  %2086 = vmatprep.subr.mxu1 %v5253_v30  ;;  %v1952_v40 = vmul.f32 %v4041_v21, %v5271_v48  ;;  %v5275_v30 = vld [vmem:[#allocation30_spill] sm:$0xff] }
 0x391   : > { %2125 = vmatprep.subr.mxu0 %v1993_v36  ;;  %v1982_v36 = vmul.f32 %v4398_v6, %v5272_v49  ;;  %v1950_v32 = vmul.f32 %v4041_v21, %v5275_v30 }
 0x393   : > { %2087 = vmatpush2.xpose.msra.mxu1 %v5255_v4 }
 0x394   : > { %2126 = vmatpush1.xpose.msra.mxu0 %v1992_v50  ;;  %2088 = vmatprep.subr.mxu1 %v5257_v12  ;;  %v1981_v50 = vmul.f32 %v4494_v13, %v5274_v24 }
 0x395   : > { %2127 = vmatprep.subr.mxu0 %v1991_v53  ;;  %v5276_v53 = vld [vmem:[#allocation37_spill] sm:$0xff] }
 0x396   : > { %v1980_v4 = vmul.f32 %v4398_v6, %v5276_v53 }
 0x397   : > { %2089 = vmatpush2.xpose.msra.mxu1 %v5259_v59  ;;  %v5280_v59 = vld [vmem:[#allocation13_spill] sm:$0xff] }
 0x398   : > { %2128 = vmatpush1.xpose.msra.mxu0 %v1990_v22  ;;  %2090 = vmatprep.subr.mxu1 %v5261_v27  ;;  %v5278_v22 = vld [vmem:[#allocation15_spill] sm:$0xff]  ;;  %v1947_v16 = vmul.f32 %v4240_v61, %v5280_v59 }
 0x399   : > { %2129 = vmatprep.subr.mxu0 %v1989_v5  ;;  %v1979_v12 = vmul.f32 %v4494_v13, %v5278_v22  ;;  %v1948_v5 = vmul.f32 %v4041_v21, %v5279_v54 }
 0x39b   : > { %2091 = vmatpush2.xpose.msra.mxu1 %v5263_v9  ;;  %v5283_v9 = vld [vmem:[#allocation22_spill] sm:$0xff] }
 0x39c   : > { %2130 = vmatpush1.xpose.msra.mxu0 %v1988_v43  ;;  %2092 = vmatprep.subr.mxu1 %v5265_v39  ;;  %v5281_v43 = vld [vmem:[#allocation29_spill] sm:$0xff]  ;;  %v1946_v10 = vmul.f32 %v4041_v21, %v5283_v9 }
 0x39d   : > { %2131 = vmatprep.subr.mxu0 %v1987_v29  ;;  %v1978_v27 = vmul.f32 %v4398_v6, %v5281_v43  ;;  %v1977_v29 = vmul.f32 %v4494_v13, %v5282_v23 }
 0x39f   : > { %2093 = vmatpush2.xpose.msra.mxu1 %v5267_v55  ;;  %v5286_v55 = vld [vmem:[#allocation18_spill] sm:$0xff] }
 0x3a0   : > { %2132 = vmatpush1.xpose.msra.mxu0 %v1986_v14  ;;  %2094 = vmatprep.subr.mxu1 %v5269_v62  ;;  %v5284_v14 = vld [vmem:[#allocation82_spill] sm:$0xff]  ;;  %v1944_v15 = vmul.f32 %v4041_v21, %v5286_v55  ;;  %v5290_v21 = vld [vmem:[#allocation85_spill] sm:$0xff] }
 0x3a1   : > { %2133 = vmatprep.subr.mxu0 %v1985_v51  ;;  %v1945_v39 = vmul.f32 %v4240_v61, %v5284_v14  ;;  %v1976_v51 = vmul.f32 %v4398_v6, %v5285_v52  ;;  %v5288_v62 = vld [vmem:[#allocation6_spill] sm:$0xff]  ;;  %v5289_v61 = vmov 0.0  }
 0x3a3   : > { %2095 = vmatpush2.xpose.msra.mxu1 %v1952_v40 }
 0x3a4   : > { %2134 = vmatpush1.xpose.msra.mxu0 %v1984_v7  ;;  %2096 = vmatprep.subr.mxu1 %v5273_v19  ;;  %v5287_v7 = vld [vmem:[#allocation7_spill] sm:$0xff] }
 0x3a5   : > { %2135 = vmatprep.subr.mxu0 %v1983_v58  ;;  %v383_v56 = vadd.f32 %v5288_v62, %v5287_v7 }
 0x3a7   : > { %2097 = vmatpush2.xpose.msra.mxu1 %v1950_v32 }
 0x3a8   : > { %2136 = vmatpush1.xpose.msra.mxu0 %v1982_v36  ;;  %2098 = vmatprep.subr.mxu1 %v5277_v44 }
 0x3a9   : > { %2137 = vmatprep.subr.mxu0 %v1981_v50 }
 0x3ab   : > { %2099 = vmatpush2.xpose.msra.mxu1 %v1948_v5 }
 0x3ac   : > { %2138 = vmatpush1.xpose.msra.mxu0 %v1980_v4  ;;  %2100 = vmatprep.subr.mxu1 %v1947_v16 }
 0x3ad   : > { %2139 = vmatprep.subr.mxu0 %v1979_v12 }
 0x3af   : > { %2101 = vmatpush2.xpose.msra.mxu1 %v1946_v10 }
 0x3b0   : > { %2140 = vmatpush1.xpose.msra.mxu0 %v1978_v27  ;;  %2102 = vmatprep.subr.mxu1 %v1945_v39 }
 0x3b1   : > { %2141 = vmatprep.subr.mxu0 %v1977_v29 }
 0x3b3   : > { %2103 = vmatpush2.xpose.msra.mxu1 %v1944_v15 }
 0x3b4   : > { %2142 = vmatpush1.xpose.msra.mxu0 %v1976_v51 }
 0x3b5   : > { %2143 = vmatprep.subr.mxu0 %v4509_v2 }
 0x3b6   : > { %2105 = vmatmul.mubr.f32.vlgmr.msra.gmra.mxu1 %v383_v56 }
 0x3b7   : > { %2257 = vmatprep.mubr.f32.mxu1 %v5289_v61 }
 0x3b8   : > { %2144 = vmatpush2.xpose.msra.mxu0 %v4414_v17  ;;  %v5291_v17 = vld [vmem:[#allocation86_spill] sm:$0xff] }
 0x3b9   : > { %2145 = vmatprep.subr.mxu0 %v4513_v11 }
 0x3bc   : > { %2146 = vmatpush2.xpose.msra.mxu0 %v4418_v1  ;;  %v5292_v1 = vld [vmem:[#allocation87_spill] sm:$0xff] }
 0x3bd   : > { %2147 = vmatprep.subr.mxu0 %v4517_v37 }
 0x3c0   : > { %2148 = vmatpush2.xpose.msra.mxu0 %v4422_v35  ;;  %v5293_v35 = vld [vmem:[#allocation88_spill] sm:$0xff] }
 0x3c1   : > { %2149 = vmatprep.subr.mxu0 %v4522_v63 }
 0x3c4   : > { %2150 = vmatpush2.xpose.msra.mxu0 %v4426_v46  ;;  %v5294_v46 = vld [vmem:[#allocation62_spill] sm:$0xff] }
 0x3c5   : > { %2151 = vmatprep.subr.mxu0 %v4526_v8 }
 0x3c8   : > { %2152 = vmatpush2.xpose.msra.mxu0 %v4430_v41  ;;  %v2009_v41 = vmul.f32 %v4494_v13, %v5294_v46 }
 0x3c9   : > { %2153 = vmatprep.subr.mxu0 %v4530_v38 }
 0x3cc   : > { %2154 = vmatpush2.xpose.msra.mxu0 %v4434_v42  ;;  %v5295_v42 = vld [vmem:[#allocation93_spill] sm:$0xff] }
 0x3cd   : > { %2155 = vmatprep.subr.mxu0 %v4534_v57 }
 0x3d0   : > { %2156 = vmatpush2.xpose.msra.mxu0 %v4438_v26  ;;  %v2008_v26 = vmul.f32 %v4398_v6, %v5295_v42  ;;  %v2187_v6 = vpop.permute.xlu0 %2186 }
 0x3d1   : > { %2157 = vmatprep.subr.mxu0 %v4538_v25  ;;  %v2743_v25 = vld [vmem:[%s2906_s17] sm:$0xff]  ;;  %s2750_s17 = scalar_lea.vmem %s2749_s23, 256 }
 0x3d2   : > { %p2752_p1 = scmp.lt.s32.totalorder %s2750_s17, %s2744_s16 }
 0x3d4   : > { %2158 = vmatpush2.xpose.msra.mxu0 %v4442_v33  ;;  %v5296_v33 = vld [vmem:[#allocation9_spill] sm:$0xff]  ;;  %p2753_p2 = por %p2752_p1, %p2751_p0 }
 0x3d5   : > { %2159 = vmatprep.subr.mxu0 %v4542_v45 }
 0x3d6   : > { %p2754_p3 = pnand %p2753_p2, %p2747_p13 }
 0x3d8   : > { %2160 = vmatpush2.xpose.msra.mxu0 %v4446_v31  ;;  %v5297_v31 = vld [vmem:[#allocation8_spill] sm:$0xff] }
 0x3d9   : > { %2161 = vmatprep.subr.mxu0 %v4546_v3  ;;  %v5298_v3 = vld [vmem:[#allocation5_spill] sm:$0xff] }
 0x3dc   : > { %2162 = vmatpush2.xpose.msra.mxu0 %v4450_v20  ;;  %v389_v20 = vadd.f32 %v5297_v31, %v5296_v33 }
 0x3dd   : > { %2163 = vmatprep.subr.mxu0 %v4550_v47 }
 0x3e0   : > { %2164 = vmatpush2.xpose.msra.mxu0 %v5290_v21 }
 0x3e1   : > { %2165 = vmatprep.subr.mxu0 %v4554_v60 }
 0x3e4   : > { %2166 = vmatpush2.xpose.msra.mxu0 %v5291_v17 }
 0x3e5   : > { %2167 = vmatprep.subr.mxu0 %v4558_v28 }
 0x3e8   : > { %2168 = vmatpush2.xpose.msra.mxu0 %v5292_v1 }
 0x3e9   : > { %2169 = vmatprep.subr.mxu0 %v4562_v18 }
 0x3ec   : > { %2170 = vmatpush2.xpose.msra.mxu0 %v5293_v35 }
 0x3ed   : > { %2171 = vmatprep.subr.mxu0 %v4566_v34 }
 0x3f0   : > { %2172 = vmatpush2.xpose.msra.mxu0 %v4470_v0  ;;  %v2182_v0 = vld [vmem:[%s4739_s3] sm:$0xf] }
 0x3f1   : > { %2173 = vmatprep.subr.mxu0 %v2009_v41 }
 0x3f4   : > { %2174 = vmatpush2.xpose.msra.mxu0 %v2008_v26 }
 0x3f7   : > { %2176 = vmatmul.mubr.f32.vlgmr.msra.gmra.mxu0 %v389_v20 }
 0x476   : > { %v2106_v2 = vpop.f32.mrf.mxu1 }
 0x478   : > { %v2108_v63 = vpop.f32.mrf.mxu1 }
 0x4b7   : > { %v2177_v11 = vpop.f32.mrf.mxu0 }
 0x4b9   : > { %v2179_v37 = vpop.f32.mrf.mxu0 }
 0x4ba   : > { %2221 = vmatprep.subr.mxu1 %v2179_v37 }
 0x4bb   : > { %2222 = vmatpush1.msra.mxu1 %v2177_v11 }
 0x4bc   : > { %2223 = vmatprep.subr.mxu1 %v2108_v63 }
 0x4bd   : > { %2224 = vmatpush1.msra.mxu1 %v2106_v2 }
 0x4be   : > { %2425 = vmatmul.mubr.msk.f32.vlgmr.msra.gmra.mxu1 %vm2189_vm3, %v2182_v0 }
 0x57e   : > { %v2259_v13 = vpop.f32.mrf.mxu1 }
 0x57f   : > { %v2260_v8 = vadd.f32 %v2259_v13, %v2187_v6 }
 0x580   : > { %v2261_v38 = vpop.f32.mrf.mxu1 }
 0x581   : > { %v2262_v57 = vadd.f32 %v2261_v38, %v2187_v6  ;;  %v2265_v45 = vadd.f32 %v2743_v25, %v2260_v8 }
 0x583   : > { %v2266_v47 = vadd.f32 %v2262_v57, %v5298_v3 }
 0x585   : > { %v2269_v60 = vcombine.low %v2265_v45, %v2266_v47 }
 0x587   : > { %2271 = vst [vmem:[%s217_s10] sm:$0xff] %v2269_v60 }
 0x588   : > { %2757 = shalt.err (!%p2754_p3)
}
 0x589   : > { %s2758_s25 = scalar_lea.hbm %s2285_s14, 128  ;;  %s2762_s6 = scalar_lea.hbm %s4741_s5, 256 }
 0x58a   : > { %p2759_p4 = scmp.ne.s32.totalorder %s2285_s14, %s2758_s25  ;;  %p2763_p9 = scmp.lt.s32.totalorder %s2285_s14, %s4741_s5 }
 0x58b   : > { %p2764_p10 = scmp.lt.s32.totalorder %s2762_s6, %s2758_s25 }
 0x58c   : > { %p2760_p7 = pnand %p2759_p4, %p2877_p5 }
 0x58d   : > { %p2765_p11 = por %p2764_p10, %p2763_p9 }
 0x58e   : > { %p2761_p8 = pneg %p2760_p7 }
 0x590   : > { %p2766_p12 = pnand %p2765_p11, %p2761_p8 }
 0x592   : > { %2769 = shalt.err (!%p2766_p12)
}
 0x593   : > { %2435 = dma.vmem_to_hbm [thread:$0]  (%p2877_p5), %s2288_s11, 128, %s2285_s14, %s2273_s15  }
 0x594 PF: > { %p2441_p13 = scmp.ge.s32.totalorder %s2804_s21, 2  ;;  %s2299_s9 = sand.u32 1, %s2792_s18  }
 0x595   : > { %s2300_s10 = scalar_lea.sflag [#allocation3], %s2299_s9 }
 0x596   : > { %p2438_p0 = pnand %p2441_p13, %p2881_p6 }
 0x598   : > { %p2439_p1 = pneg %p2438_p0 }
 0x59a   : > { %2787 = dma.done.wait (%p2439_p1), %s2300_s10, 128  }
 0x59b   : > { %2789 = vsyncadd (%p2439_p1), %s2300_s10, 4294967168  ;;  %p15_p2 = scmp.ge.s32.totalorder %s2864_s24, 4   ;;  %s5299_s18 = smov %s2796_s19 }
 0x59c   : > { %s5300_s19 = smov %s2800_s20  ;;  %s5301_s20 = smov %s2875_s27 }
 0x59d   : > { %s5302_s21 = smov %s2864_s24  ;;  %17 = sbr.rel (!%p15_p2) target bundleno = 3 (0x3), region = 75 }
 0x5a2   :  { %2305 = vsyncpa [#allocation3], 1 }
 0x5a3   :  { %2307 = vsyncpa [#allocation3 + $0x1], 1 }

</bundles_post_ra>
